<compile_context>
chip_gen: v5e
topology: v5e:2x2
jax: 0.10.0
libtpu: 0.0.40
codegen_flags: <defaults>
</compile_context>

<pallas_src>
import math

import jax
import jax.numpy as jnp
from jax.experimental import pallas as pl
from jax.experimental.pallas import tpu as pltpu

# ---- small problem sizes consistent with the module ----
B, S, H, NH = 2, 8, 32, 4
HD = H // NH
EPS = 1e-5  # config.layernorm_epsilon


# ---------- shared math helpers ----------
def _layernorm(x, g, b):
    mu = jnp.mean(x, axis=-1, keepdims=True)
    var = jnp.mean((x - mu) ** 2, axis=-1, keepdims=True)
    return (x - mu) * jax.lax.rsqrt(var + EPS) * g + b


def _gelu_tanh(x):
    # tanh-approx GELU: the tanh runs on the EUP slot instead of ~10 VALU ops for
    # a rational-erf approximation.  Deviation from exact erf-GELU is far below
    # the bf16-matmul noise floor of this kernel.
    c = math.sqrt(2.0 / math.pi)
    return 0.5 * x * (1.0 + jnp.tanh(c * (x + 0.044715 * (x * x * x))))


# ---------------------------- Pallas kernel + wrapper ----------------------------
def gpt_moe_transformer_layer(x, ltor_mask, params):
    (ln1_g, ln1_b, wqkv, bqkv, wo, bo, ln2_g, ln2_b, w1, b1, w2, b2) = params
    b, s, h = x.shape
    nh = NH
    hd = h // nh
    bs = b * s
    scale = 1.0 / math.sqrt(hd)

    # ---- wrapper-side layout / dtype prep (pure plumbing, done once) ----
    add_mask = (-10000.0 * (1.0 - ltor_mask)).astype(jnp.float32)            # (s, s)
    wqkv3 = jnp.transpose(wqkv.reshape(h, 3, h), (1, 0, 2)).astype(jnp.bfloat16)  # (3, h, h)
    bqkv3 = bqkv.reshape(3, 1, h).astype(jnp.float32)                        # (3, 1, h)
    wo_bf = wo.astype(jnp.bfloat16)
    w1_bf = w1.astype(jnp.bfloat16)
    w2_bf = w2.astype(jnp.bfloat16)

    def kernel(x_ref, mask_ref,
               ln1_g_ref, ln1_b_ref,
               wqkv_ref, bqkv_ref,
               wo_ref, bo_ref,
               ln2_g_ref, ln2_b_ref,
               w1_ref, b1_ref,
               w2_ref, b2_ref,
               out_ref):
        # Whole batch handled in one grid step: fold (b, s, h) -> (b*s, h).
        x2d = jnp.concatenate([x_ref[bi] for bi in range(b)], axis=0)        # (bs, h) f32
        add_m = mask_ref[...]                                                # (s, s): 0 / -1e4

        # ---- input_layernorm (f32) ----
        ln1 = _layernorm(x2d, ln1_g_ref[...], ln1_b_ref[...])
        ln1_bf = ln1.astype(jnp.bfloat16)

        # ---- QKV projection: bf16 operands, f32 accumulation ----
        q2d = jnp.dot(ln1_bf, wqkv_ref[0], preferred_element_type=jnp.float32) + bqkv_ref[0]
        k2d = jnp.dot(ln1_bf, wqkv_ref[1], preferred_element_type=jnp.float32) + bqkv_ref[1]
        v2d = jnp.dot(ln1_bf, wqkv_ref[2], preferred_element_type=jnp.float32) + bqkv_ref[2]

        # ---- split heads: (b*s, h) -> (b*nh, s, hd) from aligned static slices ----
        # TODO(synk): at production head_dim (>=128 lanes) replace this slice/stack
        # plumbing with a plain reshape/einshape; at hd=8 it is a handful of lane selects.
        def to_heads(t):
            return jnp.stack(
                [t[bi * s:(bi + 1) * s, hi * hd:(hi + 1) * hd]
                 for bi in range(b) for hi in range(nh)],
                axis=0)

        qh = to_heads(q2d)                       # (b*nh, s, hd) f32
        kh = to_heads(k2d)
        vh = to_heads(v2d)

        # ---- attention: one batched contraction over all (batch, head) pairs ----
        scores = jnp.einsum('hsd,htd->hst', qh, kh,
                            preferred_element_type=jnp.float32) * scale
        scores = scores + add_m[None, :, :]      # additive causal mask
        m = jnp.max(scores, axis=-1, keepdims=True)
        e = jnp.exp(scores - m)
        denom = jnp.sum(e, axis=-1, keepdims=True)
        probs = e * pl.reciprocal(denom, approx=True)          # attention_dropout = identity
        ctx = jnp.einsum('hst,htd->hsd', probs, vh,
                         preferred_element_type=jnp.float32)   # (b*nh, s, hd)

        # ---- merge heads back to (b*s, h) ----
        ctx2d = jnp.concatenate(
            [jnp.concatenate([ctx[bi * nh + hi] for hi in range(nh)], axis=-1)
             for bi in range(b)],
            axis=0)                                             # (bs, h)

        attn = jnp.dot(ctx2d.astype(jnp.bfloat16), wo_ref[...],
                       preferred_element_type=jnp.float32) + bo_ref[...]
        # output_dropout = identity (eval)

        # ---- residual 1 + post_attention_layernorm ----
        resid1 = x2d + attn
        ln2 = _layernorm(resid1, ln2_g_ref[...], ln2_b_ref[...])

        # ---- MLP (h -> 4h -> h), bf16 operands, f32 accumulation ----
        h1 = jnp.dot(ln2.astype(jnp.bfloat16), w1_ref[...],
                     preferred_element_type=jnp.float32) + b1_ref[...]
        h1 = _gelu_tanh(h1)
        mlp = jnp.dot(h1.astype(jnp.bfloat16), w2_ref[...],
                      preferred_element_type=jnp.float32) + b2_ref[...]
        # hidden dropout = identity (eval)

        out2d = resid1 + mlp                                    # (bs, h) f32

        # ---- lane-dense store: present output as (b, s*h) = (2, 256) ----
        out_flat = jnp.concatenate(
            [jnp.concatenate([out2d[bi * s + si: bi * s + si + 1, :] for si in range(s)],
                             axis=-1)
             for bi in range(b)],
            axis=0)                                             # (b, s*h)
        out_ref[...] = out_flat.astype(out_ref.dtype)

    def full(shape):
        r = len(shape)
        return pl.BlockSpec(shape, lambda i, _r=r: (0,) * _r)

    in_specs = [
        full((b, s, h)),                     # hidden_states
        full((s, s)),                        # additive causal mask
        full((1, h)), full((1, h)),          # ln1 gamma / beta
        full((3, h, h)), full((3, 1, h)),    # qkv weight (split) / bias (f32)
        full((h, h)), full((1, h)),          # attn out proj (bf16) / bias
        full((1, h)), full((1, h)),          # ln2 gamma / beta
        full((h, 4 * h)), full((1, 4 * h)),  # mlp dense_h_to_4h (bf16) / bias
        full((4 * h, h)), full((1, h)),      # mlp dense_4h_to_h (bf16) / bias
    ]

    out_flat = pl.pallas_call(
        kernel,
        out_shape=jax.ShapeDtypeStruct((b, s * h), x.dtype),
        grid=(1,),                           # whole batch in one step (no serial grid overhead)
        in_specs=in_specs,
        out_specs=pl.BlockSpec((b, s * h), lambda i: (0, 0)),
        compiler_params=pltpu.CompilerParams(dimension_semantics=("arbitrary",)),
    )(x, add_mask, ln1_g, ln1_b, wqkv3, bqkv3, wo_bf, bo,
      ln2_g, ln2_b, w1_bf, b1, w2_bf, b2)

    return out_flat.reshape(b, s, h)


# ---------------------------- pure-JAX f32 reference (module semantics) ----------------------------
def reference(x, ltor_mask, params):
    (ln1_g, ln1_b, wqkv, bqkv, wo, bo, ln2_g, ln2_b, w1, b1, w2, b2) = params
    b, s, h = x.shape
    nh, hd = NH, h // NH

    ln1 = _layernorm(x, ln1_g, ln1_b)
    qkv = ln1 @ wqkv + bqkv
    q, k, v = qkv[..., :h], qkv[..., h:2 * h], qkv[..., 2 * h:]

    def heads(t):  # (b, s, h) -> (b, nh, s, hd)
        return jnp.transpose(t.reshape(b, s, nh, hd), (0, 2, 1, 3))

    qh, kh, vh = heads(q), heads(k), heads(v)
    scores = jnp.einsum('bnsd,bntd->bnst', qh, kh) / math.sqrt(hd)
    mask = ltor_mask[None, None]
    scores = scores * mask - 10000.0 * (1.0 - mask)
    probs = jax.nn.softmax(scores, axis=-1)
    ctx = jnp.einsum('bnst,bntd->bnsd', probs, vh)
    ctx = jnp.transpose(ctx, (0, 2, 1, 3)).reshape(b, s, h)
    attn = ctx @ wo + bo
    r1 = x + attn
    ln2 = _layernorm(r1, ln2_g, ln2_b)
    inter = ln2 @ w1 + b1
    inter = 0.5 * inter * (1.0 + jax.lax.erf(inter / math.sqrt(2.0)))  # exact F.gelu
    mlp = inter @ w2 + b2
    return r1 + mlp


# ---------------------------- main ----------------------------
if __name__ == "__main__":
    key = jax.random.PRNGKey(0)
    keys = jax.random.split(key, 16)

    def init(k, shape, scale=0.02):
        return (scale * jax.random.normal(k, shape)).astype(jnp.float32)

    # Parameters (synthetic, deterministic). Linear weights stored as (in, out),
    # i.e. already transposed relative to torch's nn.Linear.weight layout.
    ln1_g = jnp.ones((1, H), jnp.float32)
    ln1_b = init(keys[0], (1, H))
    wqkv = init(keys[1], (H, 3 * H))
    bqkv = init(keys[2], (1, 3 * H))
    wo = init(keys[3], (H, H))
    bo = init(keys[4], (1, H))
    ln2_g = jnp.ones((1, H), jnp.float32)
    ln2_b = init(keys[5], (1, H))
    w1 = init(keys[6], (H, 4 * H))
    b1 = init(keys[7], (1, 4 * H))
    w2 = init(keys[8], (4 * H, H))
    b2 = init(keys[9], (1, H))
    params = (ln1_g, ln1_b, wqkv, bqkv, wo, bo, ln2_g, ln2_b, w1, b1, w2, b2)

    x = init(keys[10], (B, S, H), scale=1.0)
    ltor_mask = jnp.tril(jnp.ones((S, S), jnp.float32))  # causal mask of ones

    out = jax.block_until_ready(gpt_moe_transformer_layer(x, ltor_mask, params))
    ref = reference(x, ltor_mask, params)

    assert out.shape == (B, S, H)
    # Kernel uses bf16 matmul operands (f32 accumulation), approx reciprocal and
    # tanh-GELU; compare against the pure-f32 exact reference with a matching tolerance.
    assert jnp.allclose(out, ref, rtol=2e-3, atol=2e-3), "mismatch vs JAX reference"

    print("KERNEL_OK")
</pallas_src>

<mosaic_0001>
module attributes {stable_mosaic.version = 11 : i64} {
  func.func @kernel(%arg0: i32, %arg1: memref<2x8x32xf32, #tpu.memory_space<vmem>>, %arg2: memref<8x8xf32, #tpu.memory_space<vmem>>, %arg3: memref<1x32xf32, #tpu.memory_space<vmem>>, %arg4: memref<1x32xf32, #tpu.memory_space<vmem>>, %arg5: memref<3x32x32xbf16, #tpu.memory_space<vmem>>, %arg6: memref<3x1x32xf32, #tpu.memory_space<vmem>>, %arg7: memref<32x32xbf16, #tpu.memory_space<vmem>>, %arg8: memref<1x32xf32, #tpu.memory_space<vmem>>, %arg9: memref<1x32xf32, #tpu.memory_space<vmem>>, %arg10: memref<1x32xf32, #tpu.memory_space<vmem>>, %arg11: memref<32x128xbf16, #tpu.memory_space<vmem>>, %arg12: memref<1x128xf32, #tpu.memory_space<vmem>>, %arg13: memref<128x32xbf16, #tpu.memory_space<vmem>>, %arg14: memref<1x32xf32, #tpu.memory_space<vmem>>, %arg15: memref<2x256xf32, #tpu.memory_space<vmem>>) attributes {dimension_semantics = [#tpu.dimension_semantics<arbitrary>], iteration_bounds = array<i64: 1>, scalar_prefetch = 0 : i64, scratch_operands = 0 : i64, tpu.core_type = #tpu.core_type<tc>, window_params = [{pipeline_mode = #tpu.pipeline_mode<synchronous>, transform_indices = @transform_0, window_bounds = array<i64: 2, 8, 32>}, {pipeline_mode = #tpu.pipeline_mode<synchronous>, transform_indices = @transform_1, window_bounds = array<i64: 8, 8>}, {pipeline_mode = #tpu.pipeline_mode<synchronous>, transform_indices = @transform_2, window_bounds = array<i64: 1, 32>}, {pipeline_mode = #tpu.pipeline_mode<synchronous>, transform_indices = @transform_3, window_bounds = array<i64: 1, 32>}, {pipeline_mode = #tpu.pipeline_mode<synchronous>, transform_indices = @transform_4, window_bounds = array<i64: 3, 32, 32>}, {pipeline_mode = #tpu.pipeline_mode<synchronous>, transform_indices = @transform_5, window_bounds = array<i64: 3, 1, 32>}, {pipeline_mode = #tpu.pipeline_mode<synchronous>, transform_indices = @transform_6, window_bounds = array<i64: 32, 32>}, {pipeline_mode = #tpu.pipeline_mode<synchronous>, transform_indices = @transform_7, window_bounds = array<i64: 1, 32>}, {pipeline_mode = #tpu.pipeline_mode<synchronous>, transform_indices = @transform_8, window_bounds = array<i64: 1, 32>}, {pipeline_mode = #tpu.pipeline_mode<synchronous>, transform_indices = @transform_9, window_bounds = array<i64: 1, 32>}, {pipeline_mode = #tpu.pipeline_mode<synchronous>, transform_indices = @transform_10, window_bounds = array<i64: 32, 128>}, {pipeline_mode = #tpu.pipeline_mode<synchronous>, transform_indices = @transform_11, window_bounds = array<i64: 1, 128>}, {pipeline_mode = #tpu.pipeline_mode<synchronous>, transform_indices = @transform_12, window_bounds = array<i64: 128, 32>}, {pipeline_mode = #tpu.pipeline_mode<synchronous>, transform_indices = @transform_13, window_bounds = array<i64: 1, 32>}, {pipeline_mode = #tpu.pipeline_mode<synchronous>, transform_indices = @transform_14, window_bounds = array<i64: 2, 256>}]} {
    %c0 = arith.constant 0 : index
    %c0_0 = arith.constant 0 : index
    %c0_1 = arith.constant 0 : index
    %0 = vector.load %arg1[%c0, %c0_0, %c0_1] : memref<2x8x32xf32, #tpu.memory_space<vmem>>, vector<1x8x32xf32>
    %1 = vector.shape_cast %0 : vector<1x8x32xf32> to vector<8x32xf32>
    %c1 = arith.constant 1 : index
    %c0_2 = arith.constant 0 : index
    %c0_3 = arith.constant 0 : index
    %2 = vector.load %arg1[%c1, %c0_2, %c0_3] : memref<2x8x32xf32, #tpu.memory_space<vmem>>, vector<1x8x32xf32>
    %3 = vector.shape_cast %2 : vector<1x8x32xf32> to vector<8x32xf32>
    %4 = tpu.concatenate %1, %3 in 0 : vector<8x32xf32>, vector<8x32xf32> -> vector<16x32xf32>
    %c0_4 = arith.constant 0 : index
    %c0_5 = arith.constant 0 : index
    %5 = vector.load %arg2[%c0_4, %c0_5] : memref<8x8xf32, #tpu.memory_space<vmem>>, vector<8x8xf32>
    %c0_6 = arith.constant 0 : index
    %c0_7 = arith.constant 0 : index
    %6 = vector.load %arg3[%c0_6, %c0_7] : memref<1x32xf32, #tpu.memory_space<vmem>>, vector<1x32xf32>
    %c0_8 = arith.constant 0 : index
    %c0_9 = arith.constant 0 : index
    %7 = vector.load %arg4[%c0_8, %c0_9] : memref<1x32xf32, #tpu.memory_space<vmem>>, vector<1x32xf32>
    %cst = arith.constant dense<0.000000e+00> : vector<16xf32>
    %8 = vector.multi_reduction <add>, %4, %cst [1] : vector<16x32xf32> to vector<16xf32>
    %9 = vector.shape_cast %8 : vector<16xf32> to vector<16x1xf32>
    %cst_10 = arith.constant 3.200000e+01 : f32
    %10 = vector.broadcast %cst_10 : f32 to vector<16x1xf32>
    %11 = arith.divf %9, %10 : vector<16x1xf32>
    %12 = vector.broadcast %11 : vector<16x1xf32> to vector<16x32xf32>
    %13 = arith.subf %4, %12 : vector<16x32xf32>
    %14 = arith.mulf %13, %13 : vector<16x32xf32>
    %cst_11 = arith.constant dense<0.000000e+00> : vector<16xf32>
    %15 = vector.multi_reduction <add>, %14, %cst_11 [1] : vector<16x32xf32> to vector<16xf32>
    %16 = vector.shape_cast %15 : vector<16xf32> to vector<16x1xf32>
    %cst_12 = arith.constant 3.200000e+01 : f32
    %17 = vector.broadcast %cst_12 : f32 to vector<16x1xf32>
    %18 = arith.divf %16, %17 : vector<16x1xf32>
    %19 = vector.broadcast %11 : vector<16x1xf32> to vector<16x32xf32>
    %20 = arith.subf %4, %19 : vector<16x32xf32>
    %cst_13 = arith.constant 9.99999974E-6 : f32
    %21 = vector.broadcast %cst_13 : f32 to vector<16x1xf32>
    %22 = arith.addf %18, %21 : vector<16x1xf32>
    %23 = math.rsqrt %22 : vector<16x1xf32>
    %24 = vector.broadcast %23 : vector<16x1xf32> to vector<16x32xf32>
    %25 = arith.mulf %20, %24 : vector<16x32xf32>
    %26 = vector.broadcast %6 : vector<1x32xf32> to vector<16x32xf32>
    %27 = arith.mulf %25, %26 : vector<16x32xf32>
    %28 = vector.broadcast %7 : vector<1x32xf32> to vector<16x32xf32>
    %29 = arith.addf %27, %28 : vector<16x32xf32>
    %30 = arith.truncf %29 : vector<16x32xf32> to vector<16x32xbf16>
    %c0_14 = arith.constant 0 : index
    %c0_15 = arith.constant 0 : index
    %c0_16 = arith.constant 0 : index
    %31 = vector.load %arg5[%c0_14, %c0_15, %c0_16] : memref<3x32x32xbf16, #tpu.memory_space<vmem>>, vector<1x32x32xbf16>
    %32 = vector.shape_cast %31 : vector<1x32x32xbf16> to vector<32x32xbf16>
    %cst_17 = arith.constant dense<0.000000e+00> : vector<16x32xf32>
    %33 = tpu.matmul %30, %32, %cst_17 {dimension_numbers = #tpu.dot_dimension_numbers<[1], [0], [0], [1], [0, 0, 1, 1], [], []>} : vector<16x32xbf16>, vector<32x32xbf16>, vector<16x32xf32> -> vector<16x32xf32>
    %c0_18 = arith.constant 0 : index
    %c0_19 = arith.constant 0 : index
    %c0_20 = arith.constant 0 : index
    %34 = vector.load %arg6[%c0_18, %c0_19, %c0_20] : memref<3x1x32xf32, #tpu.memory_space<vmem>>, vector<1x1x32xf32>
    %35 = vector.shape_cast %34 : vector<1x1x32xf32> to vector<1x32xf32>
    %36 = vector.broadcast %35 : vector<1x32xf32> to vector<16x32xf32>
    %37 = arith.addf %33, %36 : vector<16x32xf32>
    %c1_21 = arith.constant 1 : index
    %c0_22 = arith.constant 0 : index
    %c0_23 = arith.constant 0 : index
    %38 = vector.load %arg5[%c1_21, %c0_22, %c0_23] : memref<3x32x32xbf16, #tpu.memory_space<vmem>>, vector<1x32x32xbf16>
    %39 = vector.shape_cast %38 : vector<1x32x32xbf16> to vector<32x32xbf16>
    %cst_24 = arith.constant dense<0.000000e+00> : vector<16x32xf32>
    %40 = tpu.matmul %30, %39, %cst_24 {dimension_numbers = #tpu.dot_dimension_numbers<[1], [0], [0], [1], [0, 0, 1, 1], [], []>} : vector<16x32xbf16>, vector<32x32xbf16>, vector<16x32xf32> -> vector<16x32xf32>
    %c1_25 = arith.constant 1 : index
    %c0_26 = arith.constant 0 : index
    %c0_27 = arith.constant 0 : index
    %41 = vector.load %arg6[%c1_25, %c0_26, %c0_27] : memref<3x1x32xf32, #tpu.memory_space<vmem>>, vector<1x1x32xf32>
    %42 = vector.shape_cast %41 : vector<1x1x32xf32> to vector<1x32xf32>
    %43 = vector.broadcast %42 : vector<1x32xf32> to vector<16x32xf32>
    %44 = arith.addf %40, %43 : vector<16x32xf32>
    %c2 = arith.constant 2 : index
    %c0_28 = arith.constant 0 : index
    %c0_29 = arith.constant 0 : index
    %45 = vector.load %arg5[%c2, %c0_28, %c0_29] : memref<3x32x32xbf16, #tpu.memory_space<vmem>>, vector<1x32x32xbf16>
    %46 = vector.shape_cast %45 : vector<1x32x32xbf16> to vector<32x32xbf16>
    %cst_30 = arith.constant dense<0.000000e+00> : vector<16x32xf32>
    %47 = tpu.matmul %30, %46, %cst_30 {dimension_numbers = #tpu.dot_dimension_numbers<[1], [0], [0], [1], [0, 0, 1, 1], [], []>} : vector<16x32xbf16>, vector<32x32xbf16>, vector<16x32xf32> -> vector<16x32xf32>
    %c2_31 = arith.constant 2 : index
    %c0_32 = arith.constant 0 : index
    %c0_33 = arith.constant 0 : index
    %48 = vector.load %arg6[%c2_31, %c0_32, %c0_33] : memref<3x1x32xf32, #tpu.memory_space<vmem>>, vector<1x1x32xf32>
    %49 = vector.shape_cast %48 : vector<1x1x32xf32> to vector<1x32xf32>
    %50 = vector.broadcast %49 : vector<1x32xf32> to vector<16x32xf32>
    %51 = arith.addf %47, %50 : vector<16x32xf32>
    %52 = vector.extract_strided_slice %37 {offsets = [0, 0], sizes = [8, 8], strides = [1, 1]} : vector<16x32xf32> to vector<8x8xf32>
    %53 = vector.extract_strided_slice %37 {offsets = [0, 8], sizes = [8, 8], strides = [1, 1]} : vector<16x32xf32> to vector<8x8xf32>
    %54 = vector.extract_strided_slice %37 {offsets = [0, 16], sizes = [8, 8], strides = [1, 1]} : vector<16x32xf32> to vector<8x8xf32>
    %55 = vector.extract_strided_slice %37 {offsets = [0, 24], sizes = [8, 8], strides = [1, 1]} : vector<16x32xf32> to vector<8x8xf32>
    %56 = vector.extract_strided_slice %37 {offsets = [8, 0], sizes = [8, 8], strides = [1, 1]} : vector<16x32xf32> to vector<8x8xf32>
    %57 = vector.extract_strided_slice %37 {offsets = [8, 8], sizes = [8, 8], strides = [1, 1]} : vector<16x32xf32> to vector<8x8xf32>
    %58 = vector.extract_strided_slice %37 {offsets = [8, 16], sizes = [8, 8], strides = [1, 1]} : vector<16x32xf32> to vector<8x8xf32>
    %59 = vector.extract_strided_slice %37 {offsets = [8, 24], sizes = [8, 8], strides = [1, 1]} : vector<16x32xf32> to vector<8x8xf32>
    %60 = vector.shape_cast %52 : vector<8x8xf32> to vector<1x8x8xf32>
    %61 = vector.shape_cast %53 : vector<8x8xf32> to vector<1x8x8xf32>
    %62 = vector.shape_cast %54 : vector<8x8xf32> to vector<1x8x8xf32>
    %63 = vector.shape_cast %55 : vector<8x8xf32> to vector<1x8x8xf32>
    %64 = vector.shape_cast %56 : vector<8x8xf32> to vector<1x8x8xf32>
    %65 = vector.shape_cast %57 : vector<8x8xf32> to vector<1x8x8xf32>
    %66 = vector.shape_cast %58 : vector<8x8xf32> to vector<1x8x8xf32>
    %67 = vector.shape_cast %59 : vector<8x8xf32> to vector<1x8x8xf32>
    %68 = tpu.concatenate %60, %61, %62, %63, %64, %65, %66, %67 in 0 : vector<1x8x8xf32>, vector<1x8x8xf32>, vector<1x8x8xf32>, vector<1x8x8xf32>, vector<1x8x8xf32>, vector<1x8x8xf32>, vector<1x8x8xf32>, vector<1x8x8xf32> -> vector<8x8x8xf32>
    %69 = vector.extract_strided_slice %44 {offsets = [0, 0], sizes = [8, 8], strides = [1, 1]} : vector<16x32xf32> to vector<8x8xf32>
    %70 = vector.extract_strided_slice %44 {offsets = [0, 8], sizes = [8, 8], strides = [1, 1]} : vector<16x32xf32> to vector<8x8xf32>
    %71 = vector.extract_strided_slice %44 {offsets = [0, 16], sizes = [8, 8], strides = [1, 1]} : vector<16x32xf32> to vector<8x8xf32>
    %72 = vector.extract_strided_slice %44 {offsets = [0, 24], sizes = [8, 8], strides = [1, 1]} : vector<16x32xf32> to vector<8x8xf32>
    %73 = vector.extract_strided_slice %44 {offsets = [8, 0], sizes = [8, 8], strides = [1, 1]} : vector<16x32xf32> to vector<8x8xf32>
    %74 = vector.extract_strided_slice %44 {offsets = [8, 8], sizes = [8, 8], strides = [1, 1]} : vector<16x32xf32> to vector<8x8xf32>
    %75 = vector.extract_strided_slice %44 {offsets = [8, 16], sizes = [8, 8], strides = [1, 1]} : vector<16x32xf32> to vector<8x8xf32>
    %76 = vector.extract_strided_slice %44 {offsets = [8, 24], sizes = [8, 8], strides = [1, 1]} : vector<16x32xf32> to vector<8x8xf32>
    %77 = vector.shape_cast %69 : vector<8x8xf32> to vector<1x8x8xf32>
    %78 = vector.shape_cast %70 : vector<8x8xf32> to vector<1x8x8xf32>
    %79 = vector.shape_cast %71 : vector<8x8xf32> to vector<1x8x8xf32>
    %80 = vector.shape_cast %72 : vector<8x8xf32> to vector<1x8x8xf32>
    %81 = vector.shape_cast %73 : vector<8x8xf32> to vector<1x8x8xf32>
    %82 = vector.shape_cast %74 : vector<8x8xf32> to vector<1x8x8xf32>
    %83 = vector.shape_cast %75 : vector<8x8xf32> to vector<1x8x8xf32>
    %84 = vector.shape_cast %76 : vector<8x8xf32> to vector<1x8x8xf32>
    %85 = tpu.concatenate %77, %78, %79, %80, %81, %82, %83, %84 in 0 : vector<1x8x8xf32>, vector<1x8x8xf32>, vector<1x8x8xf32>, vector<1x8x8xf32>, vector<1x8x8xf32>, vector<1x8x8xf32>, vector<1x8x8xf32>, vector<1x8x8xf32> -> vector<8x8x8xf32>
    %86 = vector.extract_strided_slice %51 {offsets = [0, 0], sizes = [8, 8], strides = [1, 1]} : vector<16x32xf32> to vector<8x8xf32>
    %87 = vector.extract_strided_slice %51 {offsets = [0, 8], sizes = [8, 8], strides = [1, 1]} : vector<16x32xf32> to vector<8x8xf32>
    %88 = vector.extract_strided_slice %51 {offsets = [0, 16], sizes = [8, 8], strides = [1, 1]} : vector<16x32xf32> to vector<8x8xf32>
    %89 = vector.extract_strided_slice %51 {offsets = [0, 24], sizes = [8, 8], strides = [1, 1]} : vector<16x32xf32> to vector<8x8xf32>
    %90 = vector.extract_strided_slice %51 {offsets = [8, 0], sizes = [8, 8], strides = [1, 1]} : vector<16x32xf32> to vector<8x8xf32>
    %91 = vector.extract_strided_slice %51 {offsets = [8, 8], sizes = [8, 8], strides = [1, 1]} : vector<16x32xf32> to vector<8x8xf32>
    %92 = vector.extract_strided_slice %51 {offsets = [8, 16], sizes = [8, 8], strides = [1, 1]} : vector<16x32xf32> to vector<8x8xf32>
    %93 = vector.extract_strided_slice %51 {offsets = [8, 24], sizes = [8, 8], strides = [1, 1]} : vector<16x32xf32> to vector<8x8xf32>
    %94 = vector.shape_cast %86 : vector<8x8xf32> to vector<1x8x8xf32>
    %95 = vector.shape_cast %87 : vector<8x8xf32> to vector<1x8x8xf32>
    %96 = vector.shape_cast %88 : vector<8x8xf32> to vector<1x8x8xf32>
    %97 = vector.shape_cast %89 : vector<8x8xf32> to vector<1x8x8xf32>
    %98 = vector.shape_cast %90 : vector<8x8xf32> to vector<1x8x8xf32>
    %99 = vector.shape_cast %91 : vector<8x8xf32> to vector<1x8x8xf32>
    %100 = vector.shape_cast %92 : vector<8x8xf32> to vector<1x8x8xf32>
    %101 = vector.shape_cast %93 : vector<8x8xf32> to vector<1x8x8xf32>
    %102 = tpu.concatenate %94, %95, %96, %97, %98, %99, %100, %101 in 0 : vector<1x8x8xf32>, vector<1x8x8xf32>, vector<1x8x8xf32>, vector<1x8x8xf32>, vector<1x8x8xf32>, vector<1x8x8xf32>, vector<1x8x8xf32>, vector<1x8x8xf32> -> vector<8x8x8xf32>
    "tpu.trace_start"() <{level = 10 : i32, message = "hsd,htd->hst"}> : () -> ()
    %cst_34 = arith.constant dense<0.000000e+00> : vector<8x8x8xf32>
    %103 = tpu.matmul %68, %85, %cst_34 {dimension_numbers = #tpu.dot_dimension_numbers<[2], [2], [1], [1], [0, 0, 0, 1, 1, 1], [0], [0]>} : vector<8x8x8xf32>, vector<8x8x8xf32>, vector<8x8x8xf32> -> vector<8x8x8xf32>
    "tpu.trace_stop"() : () -> ()
    %cst_35 = arith.constant 0.353553385 : f32
    %104 = vector.broadcast %cst_35 : f32 to vector<8x8x8xf32>
    %105 = arith.mulf %103, %104 : vector<8x8x8xf32>
    %106 = vector.shape_cast %5 : vector<8x8xf32> to vector<1x8x8xf32>
    %107 = vector.broadcast %106 : vector<1x8x8xf32> to vector<8x8x8xf32>
    %108 = arith.addf %105, %107 : vector<8x8x8xf32>
    %cst_36 = arith.constant dense<0xFF800000> : vector<8x8xf32>
    %109 = vector.multi_reduction <maximumf>, %108, %cst_36 [2] : vector<8x8x8xf32> to vector<8x8xf32>
    %110 = vector.shape_cast %109 : vector<8x8xf32> to vector<8x8x1xf32>
    %111 = vector.broadcast %110 : vector<8x8x1xf32> to vector<8x8x8xf32>
    %112 = arith.subf %108, %111 : vector<8x8x8xf32>
    %113 = math.exp %112 : vector<8x8x8xf32>
    %cst_37 = arith.constant dense<0.000000e+00> : vector<8x8xf32>
    %114 = vector.multi_reduction <add>, %113, %cst_37 [2] : vector<8x8x8xf32> to vector<8x8xf32>
    %115 = vector.shape_cast %114 : vector<8x8xf32> to vector<8x8x1xf32>
    %116 = tpu.reciprocal %115 {approx = true} : vector<8x8x1xf32> -> vector<8x8x1xf32>
    %117 = vector.broadcast %116 : vector<8x8x1xf32> to vector<8x8x8xf32>
    %118 = arith.mulf %113, %117 : vector<8x8x8xf32>
    "tpu.trace_start"() <{level = 10 : i32, message = "hst,htd->hsd"}> : () -> ()
    %cst_38 = arith.constant dense<0.000000e+00> : vector<8x8x8xf32>
    %119 = tpu.matmul %118, %102, %cst_38 {dimension_numbers = #tpu.dot_dimension_numbers<[2], [1], [1], [2], [0, 0, 0, 1, 1, 2], [0], [0]>} : vector<8x8x8xf32>, vector<8x8x8xf32>, vector<8x8x8xf32> -> vector<8x8x8xf32>
    "tpu.trace_stop"() : () -> ()
    %120 = vector.extract_strided_slice %119 {offsets = [0, 0, 0], sizes = [1, 8, 8], strides = [1, 1, 1]} : vector<8x8x8xf32> to vector<1x8x8xf32>
    %121 = vector.shape_cast %120 : vector<1x8x8xf32> to vector<8x8xf32>
    %122 = vector.extract_strided_slice %119 {offsets = [1, 0, 0], sizes = [1, 8, 8], strides = [1, 1, 1]} : vector<8x8x8xf32> to vector<1x8x8xf32>
    %123 = vector.shape_cast %122 : vector<1x8x8xf32> to vector<8x8xf32>
    %124 = vector.extract_strided_slice %119 {offsets = [2, 0, 0], sizes = [1, 8, 8], strides = [1, 1, 1]} : vector<8x8x8xf32> to vector<1x8x8xf32>
    %125 = vector.shape_cast %124 : vector<1x8x8xf32> to vector<8x8xf32>
    %126 = vector.extract_strided_slice %119 {offsets = [3, 0, 0], sizes = [1, 8, 8], strides = [1, 1, 1]} : vector<8x8x8xf32> to vector<1x8x8xf32>
    %127 = vector.shape_cast %126 : vector<1x8x8xf32> to vector<8x8xf32>
    %128 = tpu.concatenate %121, %123, %125, %127 in 1 : vector<8x8xf32>, vector<8x8xf32>, vector<8x8xf32>, vector<8x8xf32> -> vector<8x32xf32>
    %129 = vector.extract_strided_slice %119 {offsets = [4, 0, 0], sizes = [1, 8, 8], strides = [1, 1, 1]} : vector<8x8x8xf32> to vector<1x8x8xf32>
    %130 = vector.shape_cast %129 : vector<1x8x8xf32> to vector<8x8xf32>
    %131 = vector.extract_strided_slice %119 {offsets = [5, 0, 0], sizes = [1, 8, 8], strides = [1, 1, 1]} : vector<8x8x8xf32> to vector<1x8x8xf32>
    %132 = vector.shape_cast %131 : vector<1x8x8xf32> to vector<8x8xf32>
    %133 = vector.extract_strided_slice %119 {offsets = [6, 0, 0], sizes = [1, 8, 8], strides = [1, 1, 1]} : vector<8x8x8xf32> to vector<1x8x8xf32>
    %134 = vector.shape_cast %133 : vector<1x8x8xf32> to vector<8x8xf32>
    %135 = vector.extract_strided_slice %119 {offsets = [7, 0, 0], sizes = [1, 8, 8], strides = [1, 1, 1]} : vector<8x8x8xf32> to vector<1x8x8xf32>
    %136 = vector.shape_cast %135 : vector<1x8x8xf32> to vector<8x8xf32>
    %137 = tpu.concatenate %130, %132, %134, %136 in 1 : vector<8x8xf32>, vector<8x8xf32>, vector<8x8xf32>, vector<8x8xf32> -> vector<8x32xf32>
    %138 = tpu.concatenate %128, %137 in 0 : vector<8x32xf32>, vector<8x32xf32> -> vector<16x32xf32>
    %139 = arith.truncf %138 : vector<16x32xf32> to vector<16x32xbf16>
    %c0_39 = arith.constant 0 : index
    %c0_40 = arith.constant 0 : index
    %140 = vector.load %arg7[%c0_39, %c0_40] : memref<32x32xbf16, #tpu.memory_space<vmem>>, vector<32x32xbf16>
    %cst_41 = arith.constant dense<0.000000e+00> : vector<16x32xf32>
    %141 = tpu.matmul %139, %140, %cst_41 {dimension_numbers = #tpu.dot_dimension_numbers<[1], [0], [0], [1], [0, 0, 1, 1], [], []>} : vector<16x32xbf16>, vector<32x32xbf16>, vector<16x32xf32> -> vector<16x32xf32>
    %c0_42 = arith.constant 0 : index
    %c0_43 = arith.constant 0 : index
    %142 = vector.load %arg8[%c0_42, %c0_43] : memref<1x32xf32, #tpu.memory_space<vmem>>, vector<1x32xf32>
    %143 = vector.broadcast %142 : vector<1x32xf32> to vector<16x32xf32>
    %144 = arith.addf %141, %143 : vector<16x32xf32>
    %145 = arith.addf %4, %144 : vector<16x32xf32>
    %c0_44 = arith.constant 0 : index
    %c0_45 = arith.constant 0 : index
    %146 = vector.load %arg9[%c0_44, %c0_45] : memref<1x32xf32, #tpu.memory_space<vmem>>, vector<1x32xf32>
    %c0_46 = arith.constant 0 : index
    %c0_47 = arith.constant 0 : index
    %147 = vector.load %arg10[%c0_46, %c0_47] : memref<1x32xf32, #tpu.memory_space<vmem>>, vector<1x32xf32>
    %cst_48 = arith.constant dense<0.000000e+00> : vector<16xf32>
    %148 = vector.multi_reduction <add>, %145, %cst_48 [1] : vector<16x32xf32> to vector<16xf32>
    %149 = vector.shape_cast %148 : vector<16xf32> to vector<16x1xf32>
    %cst_49 = arith.constant 3.200000e+01 : f32
    %150 = vector.broadcast %cst_49 : f32 to vector<16x1xf32>
    %151 = arith.divf %149, %150 : vector<16x1xf32>
    %152 = vector.broadcast %151 : vector<16x1xf32> to vector<16x32xf32>
    %153 = arith.subf %145, %152 : vector<16x32xf32>
    %154 = arith.mulf %153, %153 : vector<16x32xf32>
    %cst_50 = arith.constant dense<0.000000e+00> : vector<16xf32>
    %155 = vector.multi_reduction <add>, %154, %cst_50 [1] : vector<16x32xf32> to vector<16xf32>
    %156 = vector.shape_cast %155 : vector<16xf32> to vector<16x1xf32>
    %cst_51 = arith.constant 3.200000e+01 : f32
    %157 = vector.broadcast %cst_51 : f32 to vector<16x1xf32>
    %158 = arith.divf %156, %157 : vector<16x1xf32>
    %159 = vector.broadcast %151 : vector<16x1xf32> to vector<16x32xf32>
    %160 = arith.subf %145, %159 : vector<16x32xf32>
    %cst_52 = arith.constant 9.99999974E-6 : f32
    %161 = vector.broadcast %cst_52 : f32 to vector<16x1xf32>
    %162 = arith.addf %158, %161 : vector<16x1xf32>
    %163 = math.rsqrt %162 : vector<16x1xf32>
    %164 = vector.broadcast %163 : vector<16x1xf32> to vector<16x32xf32>
    %165 = arith.mulf %160, %164 : vector<16x32xf32>
    %166 = vector.broadcast %146 : vector<1x32xf32> to vector<16x32xf32>
    %167 = arith.mulf %165, %166 : vector<16x32xf32>
    %168 = vector.broadcast %147 : vector<1x32xf32> to vector<16x32xf32>
    %169 = arith.addf %167, %168 : vector<16x32xf32>
    %170 = arith.truncf %169 : vector<16x32xf32> to vector<16x32xbf16>
    %c0_53 = arith.constant 0 : index
    %c0_54 = arith.constant 0 : index
    %171 = vector.load %arg11[%c0_53, %c0_54] : memref<32x128xbf16, #tpu.memory_space<vmem>>, vector<32x128xbf16>
    %cst_55 = arith.constant dense<0.000000e+00> : vector<16x128xf32>
    %172 = tpu.matmul %170, %171, %cst_55 {dimension_numbers = #tpu.dot_dimension_numbers<[1], [0], [0], [1], [0, 0, 1, 1], [], []>} : vector<16x32xbf16>, vector<32x128xbf16>, vector<16x128xf32> -> vector<16x128xf32>
    %c0_56 = arith.constant 0 : index
    %c0_57 = arith.constant 0 : index
    %173 = vector.load %arg12[%c0_56, %c0_57] : memref<1x128xf32, #tpu.memory_space<vmem>>, vector<1x128xf32>
    %174 = vector.broadcast %173 : vector<1x128xf32> to vector<16x128xf32>
    %175 = arith.addf %172, %174 : vector<16x128xf32>
    %cst_58 = arith.constant 5.000000e-01 : f32
    %176 = vector.broadcast %cst_58 : f32 to vector<16x128xf32>
    %177 = arith.mulf %176, %175 : vector<16x128xf32>
    %178 = arith.mulf %175, %175 : vector<16x128xf32>
    %179 = arith.mulf %178, %175 : vector<16x128xf32>
    %cst_59 = arith.constant 4.471500e-02 : f32
    %180 = vector.broadcast %cst_59 : f32 to vector<16x128xf32>
    %181 = arith.mulf %180, %179 : vector<16x128xf32>
    %182 = arith.addf %175, %181 : vector<16x128xf32>
    %cst_60 = arith.constant 0.797884583 : f32
    %183 = vector.broadcast %cst_60 : f32 to vector<16x128xf32>
    %184 = arith.mulf %183, %182 : vector<16x128xf32>
    %185 = math.tanh %184 : vector<16x128xf32>
    %cst_61 = arith.constant 1.000000e+00 : f32
    %186 = vector.broadcast %cst_61 : f32 to vector<16x128xf32>
    %187 = arith.addf %186, %185 : vector<16x128xf32>
    %188 = arith.mulf %177, %187 : vector<16x128xf32>
    %189 = arith.truncf %188 : vector<16x128xf32> to vector<16x128xbf16>
    %c0_62 = arith.constant 0 : index
    %c0_63 = arith.constant 0 : index
    %190 = vector.load %arg13[%c0_62, %c0_63] : memref<128x32xbf16, #tpu.memory_space<vmem>>, vector<128x32xbf16>
    %cst_64 = arith.constant dense<0.000000e+00> : vector<16x32xf32>
    %191 = tpu.matmul %189, %190, %cst_64 {dimension_numbers = #tpu.dot_dimension_numbers<[1], [0], [0], [1], [0, 0, 1, 1], [], []>} : vector<16x128xbf16>, vector<128x32xbf16>, vector<16x32xf32> -> vector<16x32xf32>
    %c0_65 = arith.constant 0 : index
    %c0_66 = arith.constant 0 : index
    %192 = vector.load %arg14[%c0_65, %c0_66] : memref<1x32xf32, #tpu.memory_space<vmem>>, vector<1x32xf32>
    %193 = vector.broadcast %192 : vector<1x32xf32> to vector<16x32xf32>
    %194 = arith.addf %191, %193 : vector<16x32xf32>
    %195 = arith.addf %145, %194 : vector<16x32xf32>
    %196 = vector.extract_strided_slice %195 {offsets = [0, 0], sizes = [1, 32], strides = [1, 1]} : vector<16x32xf32> to vector<1x32xf32>
    %197 = vector.extract_strided_slice %195 {offsets = [1, 0], sizes = [1, 32], strides = [1, 1]} : vector<16x32xf32> to vector<1x32xf32>
    %198 = vector.extract_strided_slice %195 {offsets = [2, 0], sizes = [1, 32], strides = [1, 1]} : vector<16x32xf32> to vector<1x32xf32>
    %199 = vector.extract_strided_slice %195 {offsets = [3, 0], sizes = [1, 32], strides = [1, 1]} : vector<16x32xf32> to vector<1x32xf32>
    %200 = vector.extract_strided_slice %195 {offsets = [4, 0], sizes = [1, 32], strides = [1, 1]} : vector<16x32xf32> to vector<1x32xf32>
    %201 = vector.extract_strided_slice %195 {offsets = [5, 0], sizes = [1, 32], strides = [1, 1]} : vector<16x32xf32> to vector<1x32xf32>
    %202 = vector.extract_strided_slice %195 {offsets = [6, 0], sizes = [1, 32], strides = [1, 1]} : vector<16x32xf32> to vector<1x32xf32>
    %203 = vector.extract_strided_slice %195 {offsets = [7, 0], sizes = [1, 32], strides = [1, 1]} : vector<16x32xf32> to vector<1x32xf32>
    %204 = tpu.concatenate %196, %197, %198, %199, %200, %201, %202, %203 in 1 : vector<1x32xf32>, vector<1x32xf32>, vector<1x32xf32>, vector<1x32xf32>, vector<1x32xf32>, vector<1x32xf32>, vector<1x32xf32>, vector<1x32xf32> -> vector<1x256xf32>
    %205 = vector.extract_strided_slice %195 {offsets = [8, 0], sizes = [1, 32], strides = [1, 1]} : vector<16x32xf32> to vector<1x32xf32>
    %206 = vector.extract_strided_slice %195 {offsets = [9, 0], sizes = [1, 32], strides = [1, 1]} : vector<16x32xf32> to vector<1x32xf32>
    %207 = vector.extract_strided_slice %195 {offsets = [10, 0], sizes = [1, 32], strides = [1, 1]} : vector<16x32xf32> to vector<1x32xf32>
    %208 = vector.extract_strided_slice %195 {offsets = [11, 0], sizes = [1, 32], strides = [1, 1]} : vector<16x32xf32> to vector<1x32xf32>
    %209 = vector.extract_strided_slice %195 {offsets = [12, 0], sizes = [1, 32], strides = [1, 1]} : vector<16x32xf32> to vector<1x32xf32>
    %210 = vector.extract_strided_slice %195 {offsets = [13, 0], sizes = [1, 32], strides = [1, 1]} : vector<16x32xf32> to vector<1x32xf32>
    %211 = vector.extract_strided_slice %195 {offsets = [14, 0], sizes = [1, 32], strides = [1, 1]} : vector<16x32xf32> to vector<1x32xf32>
    %212 = vector.extract_strided_slice %195 {offsets = [15, 0], sizes = [1, 32], strides = [1, 1]} : vector<16x32xf32> to vector<1x32xf32>
    %213 = tpu.concatenate %205, %206, %207, %208, %209, %210, %211, %212 in 1 : vector<1x32xf32>, vector<1x32xf32>, vector<1x32xf32>, vector<1x32xf32>, vector<1x32xf32>, vector<1x32xf32>, vector<1x32xf32>, vector<1x32xf32> -> vector<1x256xf32>
    %214 = tpu.concatenate %204, %213 in 0 : vector<1x256xf32>, vector<1x256xf32> -> vector<2x256xf32>
    %c0_67 = arith.constant 0 : index
    %c0_68 = arith.constant 0 : index
    %215 = vector.load %arg15[%c0_67, %c0_68] : memref<2x256xf32, #tpu.memory_space<vmem>>, vector<2x256xf32>
    tpu.vector_store %arg15[%c0_67, %c0_68], %214 {strides = array<i32>} : memref<2x256xf32, #tpu.memory_space<vmem>>, vector<2x256xf32>,
    return
  }
  func.func @transform_0(%arg0: i32) -> (i32, i32, i32) {
    %c0_i32 = arith.constant 0 : i32
    %c0_i32_0 = arith.constant 0 : i32
    %c0_i32_1 = arith.constant 0 : i32
    %c0_i32_2 = arith.constant 0 : i32
    return %c0_i32, %c0_i32_0, %c0_i32_1 : i32, i32, i32
  }
  func.func @transform_1(%arg0: i32) -> (i32, i32) {
    %c0_i32 = arith.constant 0 : i32
    %c0_i32_0 = arith.constant 0 : i32
    %c0_i32_1 = arith.constant 0 : i32
    return %c0_i32, %c0_i32_0 : i32, i32
  }
  func.func @transform_2(%arg0: i32) -> (i32, i32) {
    %c0_i32 = arith.constant 0 : i32
    %c0_i32_0 = arith.constant 0 : i32
    %c0_i32_1 = arith.constant 0 : i32
    return %c0_i32, %c0_i32_0 : i32, i32
  }
  func.func @transform_3(%arg0: i32) -> (i32, i32) {
    %c0_i32 = arith.constant 0 : i32
    %c0_i32_0 = arith.constant 0 : i32
    %c0_i32_1 = arith.constant 0 : i32
    return %c0_i32, %c0_i32_0 : i32, i32
  }
  func.func @transform_4(%arg0: i32) -> (i32, i32, i32) {
    %c0_i32 = arith.constant 0 : i32
    %c0_i32_0 = arith.constant 0 : i32
    %c0_i32_1 = arith.constant 0 : i32
    %c0_i32_2 = arith.constant 0 : i32
    return %c0_i32, %c0_i32_0, %c0_i32_1 : i32, i32, i32
  }
  func.func @transform_5(%arg0: i32) -> (i32, i32, i32) {
    %c0_i32 = arith.constant 0 : i32
    %c0_i32_0 = arith.constant 0 : i32
    %c0_i32_1 = arith.constant 0 : i32
    %c0_i32_2 = arith.constant 0 : i32
    return %c0_i32, %c0_i32_0, %c0_i32_1 : i32, i32, i32
  }
  func.func @transform_6(%arg0: i32) -> (i32, i32) {
    %c0_i32 = arith.constant 0 : i32
    %c0_i32_0 = arith.constant 0 : i32
    %c0_i32_1 = arith.constant 0 : i32
    return %c0_i32, %c0_i32_0 : i32, i32
  }
  func.func @transform_7(%arg0: i32) -> (i32, i32) {
    %c0_i32 = arith.constant 0 : i32
    %c0_i32_0 = arith.constant 0 : i32
    %c0_i32_1 = arith.constant 0 : i32
    return %c0_i32, %c0_i32_0 : i32, i32
  }
  func.func @transform_8(%arg0: i32) -> (i32, i32) {
    %c0_i32 = arith.constant 0 : i32
    %c0_i32_0 = arith.constant 0 : i32
    %c0_i32_1 = arith.constant 0 : i32
    return %c0_i32, %c0_i32_0 : i32, i32
  }
  func.func @transform_9(%arg0: i32) -> (i32, i32) {
    %c0_i32 = arith.constant 0 : i32
    %c0_i32_0 = arith.constant 0 : i32
    %c0_i32_1 = arith.constant 0 : i32
    return %c0_i32, %c0_i32_0 : i32, i32
  }
  func.func @transform_10(%arg0: i32) -> (i32, i32) {
    %c0_i32 = arith.constant 0 : i32
    %c0_i32_0 = arith.constant 0 : i32
    %c0_i32_1 = arith.constant 0 : i32
    return %c0_i32, %c0_i32_0 : i32, i32
  }
  func.func @transform_11(%arg0: i32) -> (i32, i32) {
    %c0_i32 = arith.constant 0 : i32
    %c0_i32_0 = arith.constant 0 : i32
    %c0_i32_1 = arith.constant 0 : i32
    return %c0_i32, %c0_i32_0 : i32, i32
  }
  func.func @transform_12(%arg0: i32) -> (i32, i32) {
    %c0_i32 = arith.constant 0 : i32
    %c0_i32_0 = arith.constant 0 : i32
    %c0_i32_1 = arith.constant 0 : i32
    return %c0_i32, %c0_i32_0 : i32, i32
  }
  func.func @transform_13(%arg0: i32) -> (i32, i32) {
    %c0_i32 = arith.constant 0 : i32
    %c0_i32_0 = arith.constant 0 : i32
    %c0_i32_1 = arith.constant 0 : i32
    return %c0_i32, %c0_i32_0 : i32, i32
  }
  func.func @transform_14(%arg0: i32) -> (i32, i32) {
    %c0_i32 = arith.constant 0 : i32
    %c0_i32_0 = arith.constant 0 : i32
    %c0_i32_1 = arith.constant 0 : i32
    return %c0_i32, %c0_i32_0 : i32, i32
  }
}

</mosaic_0001>

<bundles_post_ra>
// kernel: tpu_custom_call.1
= control target key start
LH: loop header
LB: loop body
LE: loop exit
PB: predicated region body
PF: predicated region fallthrough
CT: control target
= control target key end

     0   :  { %19 = vsyncpa [#allocation3], 0  ;;  %s1861_s0 = inlined_call_operand.vmem [shape: f32[2,8,32], index: 0, kind: input, shape index: {}]   ;;  %s1862_s1 = inlined_call_operand.hbm [shape: f32[8,8], index: 1, kind: input, shape index: {}]   ;;  %s1863_s2 = inlined_call_operand.hbm [shape: f32[1,32], index: 2, kind: input, shape index: {}]   ;;  %s1864_s3 = inlined_call_operand.hbm [shape: f32[1,32], index: 3, kind: input, shape index: {}]   ;;  %s1865_s4 = inlined_call_operand.vmem [shape: bf16[3,32,32], index: 4, kind: input, shape index: {}]   ;;  %s1866_s5 = inlined_call_operand.vmem [shape: f32[3,1,32], index: 5, kind: input, shape index: {}]   ;;  %s1867_s6 = inlined_call_operand.vmem [shape: bf16[32,32], index: 6, kind: input, shape index: {}]   ;;  %s1868_s7 = inlined_call_operand.vmem [shape: f32[1,32], index: 7, kind: input, shape index: {}]   ;;  %s1869_s8 = inlined_call_operand.vmem [shape: f32[1,32], index: 8, kind: input, shape index: {}]   ;;  %s1870_s9 = inlined_call_operand.vmem [shape: f32[1,32], index: 9, kind: input, shape index: {}]   ;;  %s1871_s10 = inlined_call_operand.hbm [shape: bf16[32,128], index: 10, kind: input, shape index: {}]   ;;  %s1872_s11 = inlined_call_operand.vmem [shape: f32[1,128], index: 11, kind: input, shape index: {}]   ;;  %s1873_s12 = inlined_call_operand.vmem [shape: bf16[128,32], index: 12, kind: input, shape index: {}]   ;;  %s1874_s13 = inlined_call_operand.vmem [shape: f32[1,32], index: 13, kind: input, shape index: {}]   ;;  %s1875_s14 = inlined_call_operand.hbm [shape: f32[2,256], index: 14, kind: output, shape index: {}]  }
   0x1   :  { %20 = vsyncpa [#allocation6], 0 }
   0x2   :  { %21 = vsyncpa [#allocation9], 0  ;;  %s41_s15 = sshll.u32 %s1863_s2, 4  ;;  %s42_s15 = int_to_ptr.hbm [resolvable:$true] %s41_s15 }
   0x3   :  { %22 = vsyncpa [#allocation4], 0  ;;  %s1530_s16 = smov [#allocation5]   ;;  %s30_s20 = sshll.u32 %s1862_s1, 4  ;;  %s31_s20 = int_to_ptr.hbm [resolvable:$true] %s30_s20 }
   0x4   :  { %s43_s17 = sshll.u32 %s1530_s16, 4  ;;  %s1531_s21 = smov [#allocation2]   ;;  %s44_s17 = int_to_ptr.vmem [resolvable:$true] %s43_s17 }
   0x5   :  { %46 = dma.hbm_to_vmem [thread:$0]  %s42_s15, 16, %s44_s17, [#allocation6]  }
   0x6   :  { %s32_s22 = sshll.u32 %s1531_s21, 4  ;;  %s52_s25 = sshll.u32 %s1864_s3, 4  ;;  %s33_s22 = int_to_ptr.vmem [resolvable:$true] %s32_s22  ;;  %s53_s25 = int_to_ptr.hbm [resolvable:$true] %s52_s25 }
   0x7   :  { %35 = dma.hbm_to_vmem [thread:$0]  %s31_s20, 128, %s33_s22, [#allocation3]  }
   0x8   :  { %s74_s27 = sshll.u32 %s1871_s10, 4  ;;  %s1532_s28 = smov [#allocation7]   ;;  %s75_s27 = int_to_ptr.hbm [resolvable:$true] %s74_s27 }
   0x9   :  { %s54_s29 = sshll.u32 %s1532_s28, 4  ;;  %s1533_s1 = smov [#allocation8]   ;;  %s55_s29 = int_to_ptr.vmem [resolvable:$true] %s54_s29 }
   0xa   :  { %57 = dma.hbm_to_vmem [thread:$0]  %s53_s25, 16, %s55_s29, [#allocation6]  }
   0xb   :  { %s76_s30 = sshll.u32 %s1533_s1, 4  ;;  %s1534_s15 = smov 64   ;;  %s77_s30 = int_to_ptr.vmem [resolvable:$true] %s76_s30 }
   0xc   :  { %s1535_s16 = smov 4  }
   0xd   :  { %82 = dma.hbm_to_vmem [thread:$0]  %s75_s27, 256, %s77_s30, [#allocation9], %s1534_s15, %s1534_s15, %s1535_s16  }
   0xe   :  { %1522 = dma.done.wait [#allocation3], 128  }
   0xf   :  { %1523 = vsyncadd [#allocation3], 4294967168 }
  0x10   :  { %1524 = dma.done.wait [#allocation6], 32  }
  0x11   :  { %1525 = vsyncadd [#allocation6], 4294967264 }
  0x12   :  { %1526 = dma.done.wait [#allocation9], 256  }
  0x13   :  { %1527 = vsyncadd [#allocation9], 4294967040  ;;  %vm112_vm0 = vcmask 261120   ;;  %v1638_v0 = vld [vmem:[%s1861_s0] sm:$0xff]  ;;  %v1645_v2 = vld [vmem:[%s1861_s0 + $0x8] sm:$0xff]  ;;  %v1536_v4 = vmov 32.0  }
  0x14   :  { %v113_v1 = vsel %vm112_vm0, %v1638_v0, 0.0  ;;  %v116_v3 = vsel %vm112_vm0, %v1645_v2, 0.0  ;;  %1356 = vrcp.f32 %v1536_v4  ;;  %v1298_v21 = vld [vmem:[%s1865_s4 + $0x8] sm:$0xff]  ;;  %v1300_v22 = vld [vmem:[%s1865_s4 + $0x18] sm:$0xff]  ;;  %v1297_v25 = vld [vmem:[%s1865_s4] sm:$0xff]  ;;  %vm332_vm8 = vcmask 64512  }
  0x15   :  { %114 = vadd.xlane.f32.xlu0 %v113_v1  ;;  %v1302_v23 = vld [vmem:[%s1865_s4 + $0x28] sm:$0xff]  ;;  %204 = vmatpush.bf16.msra.mxu0 %v1298_v21  ;;  %v1299_v26 = vld [vmem:[%s1865_s4 + $0x10] sm:$0xff]  ;;  %v1301_v28 = vld [vmem:[%s1865_s4 + $0x20] sm:$0xff]  ;;  %s1537_s16 = smov 120   ;;  %s1538_s3 = smov 112   ;;  %vm826_vm9 = vcmask 130048  }
  0x16   :  { %240 = vmatpush.bf16.msra.mxu1 %v1300_v22  ;;  %276 = vmatpush.bf16.msra.mxu2 %v1302_v23  ;;  %v1346_v46 = vld [vmem:[#allocation5] ss:$0 sm:$0xff]  ;;  %v1347_v51 = vld [vmem:[#allocation7] ss:$0 sm:$0xff]  ;;  %v1348_v56 = vld [vmem:[%s1866_s5] ss:$0 sm:$0xff] }
  0x17   :  { %v1349_v57 = vld [vmem:[%s1866_s5 + $0x1] ss:$0 sm:$0xff]  ;;  %s1539_s10 = smov 104   ;;  %s1541_s0 = smov 16   ;;  %vm828_vm10 = vcmask 195584  }
  0x18   :  { %s1542_s19 = smov 24   ;;  %s1543_s22 = smov 32  }
  0x19   :  { %205 = vmatpush.bf16.msra.mxu0 %v1297_v25  ;;  %s1544_s23 = smov 96  }
  0x1a   :  { %v1357_v5 = vpop.eup %1356  ;;  %241 = vmatpush.bf16.msra.mxu1 %v1299_v26  ;;  %277 = vmatpush.bf16.msra.mxu2 %v1301_v28 }
  0x1b   :  { %v120_v6 = vmul.f32 32.0, %v1357_v5  ;;  %vm124_vm1 = vweird.f32 %v1357_v5 }
  0x1d   :  { %117 = vadd.xlane.f32.xlu0 %v116_v3  ;;  %v121_v7 = vsub.f32 1.0, %v120_v6 }
  0x1f   :  { %v122_v8 = vmul.f32 %v1357_v5, %v121_v7  ;;  %v1350_v7 = vld [vmem:[%s1866_s5 + $0x2] ss:$0 sm:$0xff]  ;;  %s1540_s5 = smov 8  }
  0x21   :  { %v123_v9 = vadd.f32 %v1357_v5, %v122_v8 }
  0x23   :  { %v1649_v10 = vsel %vm124_vm1, %v1357_v5, %v123_v9 }
  0x88   :  { %v115_v11 = vpop.xlane.xlu0 %114 }
  0x89   :  { %v126_v12 = vmul.f32 %v1649_v10, %v115_v11 }
  0x8b   :  { %v128_v13 = vsub.f32 %v1638_v0, %v126_v12 }
  0x8d   :  { %v130_v14 = vmul.f32 %v128_v13, %v128_v13 }
  0x8f   :  { %v132_v15 = vsel %vm112_vm0, %v130_v14, 0.0 }
  0x90   :  { %133 = vadd.xlane.f32.xlu1 %v132_v15  ;;  %v118_v16 = vpop.xlane.xlu0 %117 }
  0x91   :  { %v127_v17 = vmul.f32 %v1649_v10, %v118_v16 }
  0x93   :  { %v129_v18 = vsub.f32 %v1645_v2, %v127_v17 }
  0x95   :  { %v131_v19 = vmul.f32 %v129_v18, %v129_v18 }
  0x97   :  { %v135_v20 = vsel %vm112_vm0, %v131_v19, 0.0 }
  0x98   :  { %136 = vadd.xlane.f32.xlu1 %v135_v20 }
 0x103   :  { %v134_v24 = vpop.xlane.xlu1 %133 }
 0x104   :  { %v138_v27 = vmul.f32 %v134_v24, %v1649_v10 }
 0x106   :  { %v140_v29 = vadd.f32 1e-05, %v138_v27 }
 0x108   :  { %1358 = vrsqrt.f32 %v140_v29  ;;  %vm148_vm3 = vweird.f32 %v140_v29 }
 0x10b   :  { %v137_v30 = vpop.xlane.xlu1 %136 }
 0x10c   :  { %v139_v31 = vmul.f32 %v137_v30, %v1649_v10 }
 0x10e   :  { %v1359_v32 = vpop.eup %1358  ;;  %v141_v33 = vadd.f32 1e-05, %v139_v31 }
 0x10f   :  { %v143_v34 = vmul.f32 %v1359_v32, %v140_v29  ;;  %vm149_vm2 = vweird.f32 %v1359_v32 }
 0x110   :  { %1360 = vrsqrt.f32 %v141_v33  ;;  %vm150_vm4 = vmor %vm148_vm3, %vm149_vm2  ;;  %vm158_vm6 = vweird.f32 %v141_v33  ;;  %vm1110_vm2 = vcmask 523264   ;;  %vm1112_vm3 = vcmask 785408  }
 0x111   :  { %v144_v35 = vmul.f32 %v1359_v32, %v143_v34 }
 0x113   :  { %v145_v36 = vmul.f32 0.5, %v144_v35 }
 0x115   :  { %v146_v37 = vsub.f32 1.5, %v145_v36 }
 0x116   :  { %v1361_v38 = vpop.eup %1360 }
 0x117   :  { %v147_v39 = vmul.f32 %v1359_v32, %v146_v37  ;;  %v153_v40 = vmul.f32 %v1361_v38, %v141_v33  ;;  %vm159_vm5 = vweird.f32 %v1361_v38 }
 0x118   :  { %vm160_vm7 = vmor %vm158_vm6, %vm159_vm5  ;;  %vm1162_vm5 = vcmask 1041408  }
 0x119   :  { %v154_v41 = vmul.f32 %v1361_v38, %v153_v40  ;;  %v151_v42 = vsel %vm150_vm4, %v1359_v32, %v147_v39  ;;  %vm1156_vm4 = vcmask 1040384  }
 0x11a   :  { %v162_v45 = vmul.f32 %v151_v42, %v128_v13 }
 0x11b   :  { %v155_v43 = vmul.f32 0.5, %v154_v41 }
 0x11c   :  { %v167_v50 = vmul.f32 %v1346_v46, %v162_v45 }
 0x11d   :  { %v156_v44 = vsub.f32 1.5, %v155_v43 }
 0x11e   :  { %v172_v53 = vadd.f32 %v1347_v51, %v167_v50 }
 0x11f   :  { %v157_v47 = vmul.f32 %v1361_v38, %v156_v44 }
 0x121   :  { %v161_v48 = vsel %vm160_vm7, %v1361_v38, %v157_v47 }
 0x122   :  { %v163_v49 = vmul.f32 %v161_v48, %v129_v18  ;;  %v109_v18 = vld [vmem:[#allocation2] sm:$0xff] }
 0x124   :  { %v168_v52 = vmul.f32 %v1346_v46, %v163_v49 }
 0x126   :  { %v173_v54 = vadd.f32 %v1347_v51, %v168_v52 }
 0x128   :  { %v174_v55 = vpack.c.bf16 %v173_v54, %v172_v53 }
 0x12a   :  { %1194 = vmatmul.msk.bf16.vlgmr.msra.gmra.mxu0 %vm112_vm0, %v174_v55  ;;  %1208 = vmatmul.msk.bf16.vlgmr.msra.gmra.mxu1 %vm112_vm0, %v174_v55 }
 0x12b   :  { %1222 = vmatmul.msk.bf16.vlgmr.msra.gmra.mxu2 %vm112_vm0, %v174_v55 }
 0x1a7   :  { %v207_v58 = vpop.f32.mrf.mxu0  ;;  %v243_v59 = vpop.f32.mrf.mxu1 }
 0x1a8   :  { %v208_v60 = vadd.f32 %v1348_v56, %v207_v58  ;;  %v244_v61 = vadd.f32 %v1349_v57, %v243_v59 }
 0x1aa   :  { %299 = vrot.lane.b32.xlu2 %v244_v61, %s1537_s16  ;;  %1223 = vmatpush.xpose.msk.msrb.mxu0 %vm332_vm8, %v244_v61 }
 0x1ab   :  { %285 = vrot.lane.b32.xlu1 %v208_v60, %s1537_s16 }
 0x1ad   :  { %1224 = vmatmul.msk.f32.vlgmr.msrb.gmra.mxu0 %vm332_vm8, %v208_v60 }
 0x1ae   :  { %v279_v6 = vpop.f32.mrf.mxu2 }
 0x1af   :  { %v245_v62 = vpop.f32.mrf.mxu1  ;;  %v209_v1 = vpop.f32.mrf.mxu0  ;;  %v1706_v8 = vadd.f32 %v1350_v7, %v279_v6 }
 0x1b0   :  { %v246_v63 = vadd.f32 %v1349_v57, %v245_v62  ;;  %v210_v3 = vadd.f32 %v1348_v56, %v209_v1 }
 0x1b2   :  { %306 = vrot.lane.b32.xlu0 %v246_v63, %s1537_s16  ;;  %301 = vrot.lane.b32.xlu2 %v244_v61, %s1538_s3 }
 0x1b3   :  { %289 = vrot.lane.b32.xlu1 %v208_v60, %s1539_s10 }
 0x1b6   :  { %v281_v11 = vpop.f32.mrf.mxu2 }
 0x1b7   :  { %v1710_v12 = vadd.f32 %v1350_v7, %v281_v11 }
 0x1ba   :  { %294 = vrot.lane.b32.xlu0 %v210_v3, %s1538_s3  ;;  %287 = vrot.lane.b32.xlu2 %v208_v60, %s1538_s3 }
 0x1c2   :  { %310 = vrot.lane.b32.xlu0 %v246_v63, %s1539_s10  ;;  %308 = vrot.lane.b32.xlu2 %v246_v63, %s1538_s3 }
 0x1ca   :  { %292 = vrot.lane.b32.xlu2 %v210_v3, %s1537_s16 }
 0x1d2   :  { %303 = vrot.lane.b32.xlu2 %v244_v61, %s1539_s10 }
 0x1da   :  { %296 = vrot.lane.b32.xlu2 %v210_v3, %s1539_s10 }
 0x204   :  { %v300_v4 = vpop.permute.xlu2 %299 }
 0x205   :  { %1225 = vmatpush.xpose.msk.msra.mxu0 %vm332_vm8, %v300_v4 }
 0x20c   :  { %v302_v5 = vpop.permute.xlu2 %301 }
 0x20d   :  { %1227 = vmatpush.xpose.msk.msrb.mxu1 %vm332_vm8, %v302_v5 }
 0x211   :  { %1231 = vmatpush.xpose.msk.msra.mxu1 %vm332_vm8, %v246_v63 }
 0x214   :  { %v288_v9 = vpop.permute.xlu2 %287 }
 0x215   :  { %1228 = vmatmul.msk.f32.vlgmr.msrb.gmra.mxu1 %vm332_vm8, %v288_v9 }
 0x216   :  { %647 = vmatpush.msrb.mxu1 %v1706_v8 }
 0x21c   :  { %v309_v13 = vpop.permute.xlu2 %308 }
 0x21d   :  { %v286_v14 = vpop.permute.xlu1 %285  ;;  %1232 = vmatmul.msk.f32.vlgmr.msra.gmra.mxu1 %vm332_vm8, %v210_v3  ;;  %1235 = vmatpush.xpose.msk.msra.mxu3 %vm332_vm8, %v309_v13 }
 0x21e   :  { %1226 = vmatmul.msk.f32.vlgmr.msra.gmra.mxu0 %vm332_vm8, %v286_v14  ;;  %739 = vmatpush.msra.mxu1 %v1710_v12 }
 0x224   :  { %v307_v15 = vpop.permute.xlu0 %306  ;;  %v293_v16 = vpop.permute.xlu2 %292 }
 0x225   :  { %1233 = vmatpush.xpose.msk.msrb.mxu2 %vm332_vm8, %v307_v15  ;;  %v290_v23 = vpop.permute.xlu1 %289 }
 0x228   :  { %1234 = vmatmul.msk.f32.vlgmr.msrb.gmra.mxu2 %vm332_vm8, %v293_v16 }
 0x22a   :  { %v354_v17 = vpop.f32.mrf.mxu0 }
 0x22b   :  { %v525_v19 = vmul.f32 0.35355338, %v354_v17 }
 0x22c   :  { %v295_v20 = vpop.permute.xlu0 %294  ;;  %v304_v21 = vpop.permute.xlu2 %303 }
 0x22d   :  { %1229 = vmatpush.xpose.msk.msrb.mxu0 %vm332_vm8, %v304_v21  ;;  %1236 = vmatmul.msk.f32.vlgmr.msra.gmra.mxu3 %vm332_vm8, %v295_v20  ;;  %v1720_v22 = vadd.f32 %v525_v19, %v109_v18 }
 0x22f   :  { %v541_v24 = vsel %vm332_vm8, %v1720_v22, -inf }
 0x230   :  { %1230 = vmatmul.msk.f32.vlgmr.msrb.gmra.mxu0 %vm332_vm8, %v290_v23  ;;  %542 = vmax.xlane.f32.xlu1 %v541_v24 }
 0x234   :  { %v311_v25 = vpop.permute.xlu0 %310  ;;  %v297_v26 = vpop.permute.xlu2 %296 }
 0x235   :  { %1237 = vmatpush.xpose.msk.msra.mxu0 %vm332_vm8, %v311_v25 }
 0x238   :  { %1238 = vmatmul.msk.f32.vlgmr.msra.gmra.mxu0 %vm332_vm8, %v297_v26 }
 0x292   :  { %v402_v27 = vpop.f32.mrf.mxu1 }
 0x293   :  { %v527_v28 = vmul.f32 0.35355338, %v402_v27 }
 0x295   :  { %v535_v29 = vadd.f32 %v527_v28, %v109_v18 }
 0x297   :  { %v547_v30 = vsel %vm332_vm8, %v535_v29, -inf }
 0x298   :  { %548 = vmax.xlane.f32.xlu0 %v547_v30 }
 0x29a   :  { %v450_v40 = vpop.f32.mrf.mxu1 }
 0x29b   :  { %v378_v31 = vpop.f32.mrf.mxu0  ;;  %v529_v45 = vmul.f32 0.35355338, %v450_v40 }
 0x29c   :  { %v526_v32 = vmul.f32 0.35355338, %v378_v31 }
 0x29d   :  { %v1732_v49 = vadd.f32 %v529_v45, %v109_v18 }
 0x29e   :  { %v534_v33 = vadd.f32 %v526_v32, %v109_v18 }
 0x29f   :  { %v553_v52 = vsel %vm332_vm8, %v1732_v49, -inf }
 0x2a0   :  { %v544_v34 = vsel %vm332_vm8, %v534_v33, -inf }
 0x2a1   :  { %545 = vmax.xlane.f32.xlu1 %v544_v34 }
 0x2a3   :  { %v543_v56 = vpop.xlane.xlu1 %542 }
 0x2a4   :  { %v565_v31 = vsub.f32 %v1720_v22, %v543_v56 }
 0x2a6   :  { %v573_v32 = vmul.f32 1.442695, %v565_v31 }
 0x2ab   :  { %v474_v35 = vpop.f32.mrf.mxu2 }
 0x2ac   :  { %v530_v36 = vmul.f32 0.35355338, %v474_v35 }
 0x2ad   :  { %v426_v37 = vpop.f32.mrf.mxu0 }
 0x2ae   :  { %v528_v38 = vmul.f32 0.35355338, %v426_v37  ;;  %v538_v39 = vadd.f32 %v530_v36, %v109_v18 }
 0x2b0   :  { %v498_v41 = vpop.f32.mrf.mxu3  ;;  %v556_v42 = vsel %vm332_vm8, %v538_v39, -inf  ;;  %v536_v43 = vadd.f32 %v528_v38, %v109_v18 }
 0x2b1   :  { %v531_v44 = vmul.f32 0.35355338, %v498_v41  ;;  %557 = vmax.xlane.f32.xlu1 %v556_v42 }
 0x2b2   :  { %v550_v46 = vsel %vm332_vm8, %v536_v43, -inf }
 0x2b3   :  { %551 = vmax.xlane.f32.xlu2 %v550_v46  ;;  %v539_v47 = vadd.f32 %v531_v44, %v109_v18 }
 0x2b5   :  { %v559_v48 = vsel %vm332_vm8, %v539_v47, -inf  ;;  %v522_v50 = vpop.f32.mrf.mxu0 }
 0x2b6   :  { %560 = vmax.xlane.f32.xlu0 %v559_v48  ;;  %v532_v51 = vmul.f32 0.35355338, %v522_v50 }
 0x2b8   :  { %v540_v53 = vadd.f32 %v532_v51, %v109_v18 }
 0x2ba   :  { %v562_v54 = vsel %vm332_vm8, %v540_v53, -inf }
 0x2bb   :  { %554 = vmax.xlane.f32.xlu2 %v553_v52 }
 0x2c3   :  { %563 = vmax.xlane.f32.xlu2 %v562_v54 }
 0x2ca   :  { %313 = vrot.lane.b32.xlu1 %v1706_v8, %s1537_s16 }
 0x2db   :  { %316 = vrot.lane.b32.xlu2 %v1706_v8, %s1538_s3 }
 0x30b   :  { %v549_v55 = vpop.xlane.xlu0 %548 }
 0x30c   :  { %v567_v57 = vsub.f32 %v535_v29, %v549_v55 }
 0x30e   :  { %v577_v58 = vmul.f32 1.442695, %v567_v57 }
 0x310   :  { %1362 = vpow2.f32 %v577_v58 }
 0x314   :  { %v546_v59 = vpop.xlane.xlu1 %545 }
 0x315   :  { %v566_v60 = vsub.f32 %v534_v33, %v546_v59 }
 0x316   :  { %v1363_v61 = vpop.eup %1362 }
 0x317   :  { %v575_v62 = vmul.f32 1.442695, %v566_v60  ;;  %v595_v63 = vsel %vm332_vm8, %v1363_v61, 0.0 }
 0x318   :  { %596 = vadd.xlane.f32.xlu1 %v595_v63 }
 0x319   :  { %1364 = vpow2.f32 %v575_v62 }
 0x31f   :  { %v1365_v1 = vpop.eup %1364 }
 0x320   :  { %v592_v3 = vsel %vm332_vm8, %v1365_v1, 0.0 }
 0x321   :  { %593 = vadd.xlane.f32.xlu0 %v592_v3 }
 0x324   :  { %v558_v4 = vpop.xlane.xlu1 %557 }
 0x325   :  { %v570_v5 = vsub.f32 %v538_v39, %v558_v4 }
 0x326   :  { %v552_v6 = vpop.xlane.xlu2 %551 }
 0x327   :  { %v583_v7 = vmul.f32 1.442695, %v570_v5  ;;  %v568_v9 = vsub.f32 %v536_v43, %v552_v6 }
 0x329   :  { %1366 = vpow2.f32 %v583_v7  ;;  %v579_v11 = vmul.f32 1.442695, %v568_v9  ;;  %v561_v13 = vpop.xlane.xlu0 %560 }
 0x32a   :  { %v571_v14 = vsub.f32 %v539_v47, %v561_v13 }
 0x32b   :  { %1368 = vpow2.f32 %v579_v11 }
 0x32c   :  { %v585_v15 = vmul.f32 1.442695, %v571_v14  ;;  %v1304_v14 = vld [vmem:[%s1867_s6 + $0x8] sm:$0xff] }
 0x32e   :  { %v555_v16 = vpop.xlane.xlu2 %554  ;;  %1370 = vpow2.f32 %v585_v15  ;;  %v1303_v15 = vld [vmem:[%s1867_s6] sm:$0xff] }
 0x32f   :  { %v1367_v17 = vpop.eup %1366  ;;  %v569_v34 = vsub.f32 %v1732_v49, %v555_v16 }
 0x330   :  { %v604_v18 = vsel %vm332_vm8, %v1367_v17, 0.0 }
 0x331   :  { %v1744_v19 = vpop.eup %1368  ;;  %323 = vrot.lane.b32.xlu1 %v1710_v12, %s1537_s16  ;;  %605 = vadd.xlane.f32.xlu2 %v604_v18  ;;  %v581_v36 = vmul.f32 1.442695, %v569_v34 }
 0x332   :  { %v598_v20 = vsel %vm332_vm8, %v1744_v19, 0.0 }
 0x333   :  { %599 = vadd.xlane.f32.xlu0 %v598_v20 }
 0x334   :  { %v1371_v23 = vpop.eup %1370 }
 0x335   :  { %v607_v26 = vsel %vm332_vm8, %v1371_v23, 0.0 }
 0x336   :  { %v564_v21 = vpop.xlane.xlu2 %563 }
 0x337   :  { %v572_v24 = vsub.f32 %v540_v53, %v564_v21 }
 0x339   :  { %v587_v25 = vmul.f32 1.442695, %v572_v24  ;;  %329 = vrot.lane.b32.xlu1 %v1710_v12, %s1539_s10 }
 0x33b   :  { %1372 = vpow2.f32 %v587_v25  ;;  %608 = vadd.xlane.f32.xlu0 %v607_v26 }
 0x33c   :  { %v314_v27 = vpop.permute.xlu1 %313  ;;  %1374 = vpow2.f32 %v573_v32 }
 0x33d   :  { %670 = vmatpush.msra.mxu2 %v314_v27  ;;  %1376 = vpow2.f32 %v581_v36 }
 0x33e   :  { %v317_v28 = vpop.permute.xlu2 %316 }
 0x33f   :  { %693 = vmatpush.msrb.mxu3 %v317_v28 }
 0x341   :  { %v1373_v29 = vpop.eup %1372 }
 0x342   :  { %v610_v30 = vsel %vm332_vm8, %v1373_v29, 0.0  ;;  %v1375_v33 = vpop.eup %1374 }
 0x343   :  { %611 = vadd.xlane.f32.xlu0 %v610_v30  ;;  %v589_v35 = vsel %vm332_vm8, %v1375_v33, 0.0  ;;  %v1377_v37 = vpop.eup %1376 }
 0x344   :  { %v601_v38 = vsel %vm332_vm8, %v1377_v37, 0.0 }
 0x349   :  { %326 = vrot.lane.b32.xlu2 %v1710_v12, %s1538_s3 }
 0x357   :  { %319 = vrot.lane.b32.xlu0 %v1706_v8, %s1539_s10 }
 0x372   :  { %590 = vadd.xlane.f32.xlu2 %v589_v35  ;;  %v1351_v35 = vld [vmem:[%s1868_s7] ss:$0 sm:$0xff]  ;;  %s1173_s7 = sshll.u32 %s1875_s14, 4  ;;  %s1174_s7 = int_to_ptr.hbm [resolvable:$true] %s1173_s7 }
 0x381   :  { %602 = vadd.xlane.f32.xlu0 %v601_v38 }
 0x38b   :  { %v597_v12 = vpop.xlane.xlu1 %596 }
 0x38c   :  { %1378 = vrcp.f32 %v597_v12 }
 0x392   :  { %v1379_v39 = vpop.eup %1378 }
 0x393   :  { %v623_v8 = vmul.f32 %v1379_v39, %v1363_v61 }
 0x394   :  { %v594_v40 = vpop.xlane.xlu0 %593 }
 0x395   :  { %1380 = vrcp.f32 %v594_v40  ;;  %1241 = vmatmul.msk.f32.vlgmr.msrb.gmra.mxu3 %vm332_vm8, %v623_v8 }
 0x39b   :  { %v1381_v22 = vpop.eup %1380 }
 0x39c   :  { %v622_v41 = vmul.f32 %v1381_v22, %v1365_v1 }
 0x39e   :  { %1240 = vmatmul.msk.f32.vlgmr.msra.gmra.mxu2 %vm332_vm8, %v622_v41 }
 0x3a3   :  { %v324_v42 = vpop.permute.xlu1 %323 }
 0x3a4   :  { %762 = vmatpush.msrb.mxu2 %v324_v42  ;;  %v606_v43 = vpop.xlane.xlu2 %605 }
 0x3a5   :  { %1382 = vrcp.f32 %v606_v43 }
 0x3a6   :  { %v600_v44 = vpop.xlane.xlu0 %599 }
 0x3ab   :  { %v1383_v45 = vpop.eup %1382  ;;  %v330_v55 = vpop.permute.xlu1 %329 }
 0x3ac   :  { %v626_v46 = vmul.f32 %v1383_v45, %v1367_v17  ;;  %v327_v47 = vpop.permute.xlu2 %326 }
 0x3ad   :  { %785 = vmatpush.msra.mxu3 %v327_v47 }
 0x3ae   :  { %v609_v48 = vpop.xlane.xlu0 %608  ;;  %1244 = vmatmul.msk.f32.vlgmr.msrb.gmra.mxu2 %vm332_vm8, %v626_v46 }
 0x3af   :  { %1384 = vrcp.f32 %v609_v48 }
 0x3b0   :  { %1386 = vrcp.f32 %v600_v44 }
 0x3b5   :  { %v1385_v49 = vpop.eup %1384 }
 0x3b6   :  { %v627_v50 = vmul.f32 %v1385_v49, %v1371_v23  ;;  %v612_v51 = vpop.xlane.xlu0 %611  ;;  %v1387_v52 = vpop.eup %1386  ;;  %v1306_v49 = vld [vmem:[#allocation8 + $0x8] sm:$0xff] }
 0x3b7   :  { %1388 = vrcp.f32 %v612_v51  ;;  %v624_v53 = vmul.f32 %v1387_v52, %v1744_v19  ;;  %971 = vmatpush.bf16.msra.mxu2 %v1306_v49 }
 0x3b8   :  { %1245 = vmatmul.msk.f32.vlgmr.msra.gmra.mxu3 %vm332_vm8, %v627_v50 }
 0x3bd   :  { %v1389_v56 = vpop.eup %1388 }
 0x3be   :  { %v628_v57 = vmul.f32 %v1389_v56, %v1373_v29 }
 0x3c9   :  { %v320_v54 = vpop.permute.xlu0 %319 }
 0x3ca   :  { %716 = vmatpush.msrb.mxu0 %v320_v54 }
 0x3cb   :  { %1242 = vmatmul.msk.f32.vlgmr.msrb.gmra.mxu0 %vm332_vm8, %v624_v53  ;;  %v1305_v53 = vld [vmem:[#allocation8] sm:$0xff] }
 0x3cc   :  { %808 = vmatpush.msra.mxu0 %v330_v55  ;;  %972 = vmatpush.bf16.msra.mxu2 %v1305_v53 }
 0x3d3   :  { %1246 = vmatmul.msk.f32.vlgmr.msra.gmra.mxu0 %vm332_vm8, %v628_v57 }
 0x3e5   :  { %v591_v58 = vpop.xlane.xlu2 %590 }
 0x3e6   :  { %1390 = vrcp.f32 %v591_v58 }
 0x3ec   :  { %v1391_v59 = vpop.eup %1390 }
 0x3ed   :  { %v621_v60 = vmul.f32 %v1391_v59, %v1375_v33 }
 0x3ef   :  { %1239 = vmatmul.msk.f32.vlgmr.msrb.gmra.mxu1 %vm332_vm8, %v621_v60 }
 0x3f0   :  { %875 = vmatpush.bf16.msrb.mxu1 %v1304_v14 }
 0x3f4   :  { %v603_v61 = vpop.xlane.xlu0 %602  ;;  %876 = vmatpush.bf16.msrb.mxu1 %v1303_v15 }
 0x3f5   :  { %1392 = vrcp.f32 %v603_v61 }
 0x3fb   :  { %v1393_v62 = vpop.eup %1392 }
 0x3fc   :  { %v625_v63 = vmul.f32 %v1393_v62, %v1377_v37 }
 0x3fe   :  { %1243 = vmatmul.msk.f32.vlgmr.msra.gmra.mxu1 %vm332_vm8, %v625_v63 }
 0x418   :  { %v695_v5 = vpop.f32.mrf.mxu3 }
 0x421   :  { %v672_v1 = vpop.f32.mrf.mxu2 }
 0x431   :  { %v764_v3 = vpop.f32.mrf.mxu2 }
 0x432   :  { %v1331_v4 = vpack.i.bf16 %v764_v3, %v672_v1 }
 0x434   :  { %1332 = vrot.lane.b32.xlu1 %v1331_v4, %s1540_s5 }
 0x43b   :  { %v787_v6 = vpop.f32.mrf.mxu3 }
 0x43c   :  { %v1336_v7 = vpack.i.bf16 %v787_v6, %v695_v5 }
 0x43e   :  { %1337 = vrot.lane.b32.xlu1 %v1336_v7, %s1541_s0 }
 0x448   :  { %v718_v9 = vpop.f32.mrf.mxu0 }
 0x450   :  { %v810_v11 = vpop.f32.mrf.mxu0 }
 0x451   :  { %v1341_v13 = vpack.i.bf16 %v810_v11, %v718_v9 }
 0x453   :  { %1342 = vrot.lane.b32.xlu1 %v1341_v13, %s1542_s19  ;;  %v1353_v13 = vld [vmem:[%s1870_s9] ss:$0 sm:$0xff] }
 0x46c   :  { %v649_v17 = vpop.f32.mrf.mxu1 }
 0x47b   :  { %v741_v24 = vpop.f32.mrf.mxu1 }
 0x4a6   :  { %v1333_v16 = vpop.permute.xlu1 %1332 }
 0x4a7   :  { %v1335_v19 = vunpack.i.h.bf16 %v1333_v16  ;;  %v1334_v20 = vunpack.i.l.bf16 %v1333_v16 }
 0x4a9   :  { %v825_v26 = vsel %vm332_vm8, %v649_v17, %v1334_v20  ;;  %v842_v27 = vsel %vm332_vm8, %v741_v24, %v1335_v19  ;;  %v1314_v20 = vld [vmem:[%s1873_s12 + $0x38] sm:$0xff]  ;;  %v1311_v24 = vld [vmem:[%s1873_s12 + $0x20] sm:$0xff] }
 0x4aa   :  { %1066 = vmatpush.bf16.msrb.mxu3 %v1314_v20 }
 0x4b0   :  { %v1338_v18 = vpop.permute.xlu1 %1337 }
 0x4b1   :  { %v1340_v21 = vunpack.i.h.bf16 %v1338_v18  ;;  %v1339_v23 = vunpack.i.l.bf16 %v1338_v18 }
 0x4b3   :  { %v827_v30 = vsel %vm826_vm9, %v825_v26, %v1339_v23  ;;  %v843_v31 = vsel %vm826_vm9, %v842_v27, %v1340_v21  ;;  %v1313_v21 = vld [vmem:[%s1873_s12 + $0x30] sm:$0xff]  ;;  %v1312_v23 = vld [vmem:[%s1873_s12 + $0x28] sm:$0xff] }
 0x4b4   :  { %1067 = vmatpush.bf16.msrb.mxu3 %v1313_v21  ;;  %v1309_v26 = vld [vmem:[%s1873_s12 + $0x10] sm:$0xff]  ;;  %v1308_v27 = vld [vmem:[%s1873_s12 + $0x8] sm:$0xff] }
 0x4b8   :  { %1068 = vmatpush.bf16.msrb.mxu3 %v1312_v23 }
 0x4bc   :  { %1069 = vmatpush.bf16.msrb.mxu3 %v1311_v24 }
 0x4c5   :  { %v1343_v25 = vpop.permute.xlu1 %1342 }
 0x4c6   :  { %v1345_v28 = vunpack.i.h.bf16 %v1343_v25  ;;  %v1344_v29 = vunpack.i.l.bf16 %v1343_v25  ;;  %v1310_v25 = vld [vmem:[%s1873_s12 + $0x18] sm:$0xff] }
 0x4c7   :  { %1070 = vmatpush.bf16.msrb.mxu3 %v1310_v25 }
 0x4c8   :  { %v829_v32 = vsel %vm828_vm10, %v827_v30, %v1344_v29  ;;  %v844_v33 = vsel %vm828_vm10, %v843_v31, %v1345_v28  ;;  %v1307_v28 = vld [vmem:[%s1873_s12] sm:$0xff] }
 0x4c9   :  { %v845_v34 = vpack.c.bf16 %v844_v33, %v829_v32  ;;  %v1354_v29 = vld [vmem:[%s1872_s11] ss:$0 sm:$0xff] }
 0x4cb   :  { %1255 = vmatmul.msk.bf16.vlgmr.msrb.gmra.mxu1 %vm112_vm0, %v845_v34  ;;  %1071 = vmatpush.bf16.msrb.mxu3 %v1309_v26 }
 0x4cf   :  { %1072 = vmatpush.bf16.msrb.mxu3 %v1308_v27 }
 0x4d3   :  { %1073 = vmatpush.bf16.msrb.mxu3 %v1307_v28 }
 0x548   :  { %v878_v36 = vpop.f32.mrf.mxu1 }
 0x549   :  { %v879_v37 = vadd.f32 %v1351_v35, %v878_v36 }
 0x54b   :  { %v1784_v38 = vadd.f32 %v879_v37, %v1638_v0 }
 0x54d   :  { %v887_v12 = vsel %vm112_vm0, %v1784_v38, 0.0 }
 0x54e   :  { %888 = vadd.xlane.f32.xlu1 %v887_v12 }
 0x550   :  { %v880_v39 = vpop.f32.mrf.mxu1 }
 0x551   :  { %v881_v8 = vadd.f32 %v1351_v35, %v880_v39 }
 0x553   :  { %v1789_v40 = vadd.f32 %v1645_v2, %v881_v8 }
 0x555   :  { %v890_v22 = vsel %vm112_vm0, %v1789_v40, 0.0 }
 0x556   :  { %891 = vadd.xlane.f32.xlu2 %v890_v22 }
 0x5c1   :  { %v889_v41 = vpop.xlane.xlu1 %888 }
 0x5c2   :  { %v893_v42 = vmul.f32 %v889_v41, %v1649_v10 }
 0x5c4   :  { %v895_v43 = vsub.f32 %v1784_v38, %v893_v42 }
 0x5c6   :  { %v897_v0 = vmul.f32 %v895_v43, %v895_v43 }
 0x5c8   :  { %v899_v44 = vsel %vm112_vm0, %v897_v0, 0.0 }
 0x5c9   :  { %v892_v45 = vpop.xlane.xlu2 %891  ;;  %900 = vadd.xlane.f32.xlu0 %v899_v44 }
 0x5ca   :  { %v894_v46 = vmul.f32 %v892_v45, %v1649_v10 }
 0x5cc   :  { %v896_v47 = vsub.f32 %v1789_v40, %v894_v46 }
 0x5ce   :  { %v898_v2 = vmul.f32 %v896_v47, %v896_v47 }
 0x5d0   :  { %v902_v48 = vsel %vm112_vm0, %v898_v2, 0.0 }
 0x5d1   :  { %903 = vadd.xlane.f32.xlu2 %v902_v48 }
 0x63c   :  { %v901_v50 = vpop.xlane.xlu0 %900 }
 0x63d   :  { %v905_v51 = vmul.f32 %v901_v50, %v1649_v10  ;;  %v1355_v50 = vld [vmem:[%s1874_s13] ss:$0 sm:$0xff]  ;;  %s1545_s13 = smov [#allocation10]  }
 0x63f   :  { %v907_v52 = vadd.f32 1e-05, %v905_v51 }
 0x641   :  { %1394 = vrsqrt.f32 %v907_v52  ;;  %vm915_vm12 = vweird.f32 %v907_v52 }
 0x644   :  { %v904_v54 = vpop.xlane.xlu2 %903 }
 0x645   :  { %v906_v55 = vmul.f32 %v904_v54, %v1649_v10  ;;  %v1352_v10 = vld [vmem:[%s1869_s8] ss:$0 sm:$0xff] }
 0x647   :  { %v1395_v56 = vpop.eup %1394  ;;  %v908_v57 = vadd.f32 1e-05, %v906_v55 }
 0x648   :  { %v910_v58 = vmul.f32 %v1395_v56, %v907_v52  ;;  %vm916_vm11 = vweird.f32 %v1395_v56 }
 0x649   :  { %1396 = vrsqrt.f32 %v908_v57  ;;  %vm917_vm13 = vmor %vm915_vm12, %vm916_vm11  ;;  %vm925_vm15 = vweird.f32 %v908_v57 }
 0x64a   :  { %v911_v59 = vmul.f32 %v1395_v56, %v910_v58 }
 0x64c   :  { %v912_v60 = vmul.f32 0.5, %v911_v59 }
 0x64e   :  { %v913_v61 = vsub.f32 1.5, %v912_v60 }
 0x64f   :  { %v1397_v62 = vpop.eup %1396 }
 0x650   :  { %v914_v63 = vmul.f32 %v1395_v56, %v913_v61  ;;  %v920_v1 = vmul.f32 %v1397_v62, %v908_v57  ;;  %vm926_vm14 = vweird.f32 %v1397_v62 }
 0x651   :  { %vm927_vm1 = vmor %vm925_vm15, %vm926_vm14 }
 0x652   :  { %v921_v3 = vmul.f32 %v1397_v62, %v920_v1  ;;  %v918_v4 = vsel %vm917_vm13, %v1395_v56, %v914_v63 }
 0x653   :  { %v929_v7 = vmul.f32 %v918_v4, %v895_v43 }
 0x654   :  { %v922_v5 = vmul.f32 0.5, %v921_v3 }
 0x655   :  { %v934_v14 = vmul.f32 %v1352_v10, %v929_v7 }
 0x656   :  { %v923_v6 = vsub.f32 1.5, %v922_v5 }
 0x657   :  { %v939_v17 = vadd.f32 %v1353_v13, %v934_v14 }
 0x658   :  { %v924_v9 = vmul.f32 %v1397_v62, %v923_v6 }
 0x65a   :  { %v928_v11 = vsel %vm927_vm1, %v1397_v62, %v924_v9 }
 0x65b   :  { %v930_v15 = vmul.f32 %v928_v11, %v896_v47 }
 0x65d   :  { %v935_v16 = vmul.f32 %v1352_v10, %v930_v15 }
 0x65f   :  { %v940_v18 = vadd.f32 %v1353_v13, %v935_v16 }
 0x661   :  { %v941_v19 = vpack.c.bf16 %v940_v18, %v939_v17 }
 0x663   :  { %1264 = vmatmul.msk.bf16.vlgmr.msra.gmra.mxu2 %vm112_vm0, %v941_v19 }
 0x6e6   :  { %v974_v30 = vpop.f32.mrf.mxu2 }
 0x6e7   :  { %v975_v31 = vadd.f32 %v1354_v29, %v974_v30 }
 0x6e9   :  { %v981_v32 = vmul.f32 %v975_v31, %v975_v31  ;;  %v979_v45 = vmul.f32 0.5, %v975_v31 }
 0x6eb   :  { %v983_v33 = vmul.f32 %v981_v32, %v975_v31 }
 0x6ed   :  { %v985_v34 = vmul.f32 0.044715, %v983_v33 }
 0x6ee   :  { %v976_v35 = vpop.f32.mrf.mxu2 }
 0x6ef   :  { %v987_v36 = vadd.f32 %v985_v34, %v975_v31  ;;  %v977_v37 = vadd.f32 %v1354_v29, %v976_v35 }
 0x6f1   :  { %v982_v12 = vmul.f32 %v977_v37, %v977_v37  ;;  %v989_v39 = vmul.f32 0.7978846, %v987_v36  ;;  %v980_v46 = vmul.f32 0.5, %v977_v37 }
 0x6f3   :  { %v984_v8 = vmul.f32 %v982_v12, %v977_v37  ;;  %1398 = vtanh.f32 %v989_v39 }
 0x6f5   :  { %v986_v22 = vmul.f32 0.044715, %v984_v8 }
 0x6f7   :  { %v988_v41 = vadd.f32 %v986_v22, %v977_v37 }
 0x6f9   :  { %v990_v42 = vmul.f32 0.7978846, %v988_v41  ;;  %v1399_v43 = vpop.eup %1398 }
 0x6fa   :  { %v993_v0 = vadd.f32 1.0, %v1399_v43 }
 0x6fb   :  { %1400 = vtanh.f32 %v990_v42 }
 0x6fc   :  { %v995_v2 = vmul.f32 %v993_v0, %v979_v45 }
 0x701   :  { %v1401_v44 = vpop.eup %1400 }
 0x702   :  { %v994_v47 = vadd.f32 1.0, %v1401_v44 }
 0x704   :  { %v996_v48 = vmul.f32 %v994_v47, %v980_v46 }
 0x706   :  { %v997_v49 = vpack.c.bf16 %v996_v48, %v995_v2 }
 0x708   :  { %1074 = vmatmul.bf16.vlgmr.msrb.gmra.mxu3 %v997_v49 }
 0x78b   :  { %v1075_v51 = vpop.f32.mrf.mxu3 }
 0x78c   :  { %v1076_v52 = vadd.f32 %v1355_v50, %v1075_v51 }
 0x78e   :  { %v1080_v53 = vadd.f32 %v1076_v52, %v1784_v38 }
 0x790   :  { %v1101_v54 = vrot.slane %v1080_v53, 6  ;;  %v1097_v55 = vrot.slane %v1080_v53, 5  ;;  %v1105_v60 = vrot.slane %v1080_v53, 7  ;;  %v1083_v61 = vrot.slane %v1080_v53, 1 }
 0x791   :  { %v1091_v63 = vrot.slane %v1080_v53, 3  ;;  %v1087_v3 = vrot.slane %v1080_v53, 2  ;;  %v1095_v19 = vrot.slane %v1080_v53, 4 }
 0x792   :  { %1102 = vrot.lane.b32.xlu2 %v1101_v54, %s1534_s15  ;;  %1098 = vrot.lane.b32.xlu1 %v1097_v55, %s1543_s22 }
 0x793   :  { %v1077_v56 = vpop.f32.mrf.mxu3 }
 0x794   :  { %v1078_v57 = vadd.f32 %v1355_v50, %v1077_v56 }
 0x796   :  { %v1081_v58 = vadd.f32 %v1078_v57, %v1789_v40 }
 0x798   :  { %v1132_v59 = vrot.slane %v1081_v58, 5  ;;  %v1118_v62 = vrot.slane %v1081_v58, 1  ;;  %v1136_v38 = vrot.slane %v1081_v58, 6  ;;  %v1140_v1 = vrot.slane %v1081_v58, 7 }
 0x799   :  { %v1122_v40 = vrot.slane %v1081_v58, 2  ;;  %v1126_v4 = vrot.slane %v1081_v58, 3  ;;  %v1130_v13 = vrot.slane %v1081_v58, 4 }
 0x79a   :  { %1133 = vrot.lane.b32.xlu0 %v1132_v59, %s1543_s22  ;;  %1106 = vrot.lane.b32.xlu1 %v1105_v60, %s1544_s23 }
 0x79b   :  { %1084 = vrot.lane.b32.xlu2 %v1083_v61, %s1543_s22 }
 0x7a2   :  { %1119 = vrot.lane.b32.xlu0 %v1118_v62, %s1543_s22  ;;  %1092 = vrot.lane.b32.xlu1 %v1091_v63, %s1544_s23 }
 0x7a3   :  { %1137 = vrot.lane.b32.xlu2 %v1136_v38, %s1534_s15 }
 0x7aa   :  { %1141 = vrot.lane.b32.xlu0 %v1140_v1, %s1544_s23 }
 0x7ab   :  { %1088 = vrot.lane.b32.xlu2 %v1087_v3, %s1534_s15 }
 0x7b2   :  { %1123 = vrot.lane.b32.xlu0 %v1122_v40, %s1534_s15  ;;  %s1171_s15 = sshll.u32 %s1545_s13, 4  ;;  %s1172_s15 = int_to_ptr.vmem [resolvable:$true] %s1171_s15 }
 0x7ba   :  { %1127 = vrot.lane.b32.xlu0 %v1126_v4, %s1544_s23 }
 0x7ec   :  { %v1103_v6 = vpop.permute.xlu2 %1102 }
 0x7f5   :  { %v1085_v7 = vpop.permute.xlu2 %1084 }
 0x7f6   :  { %v1109_v32 = vsel %vm112_vm0, %v1080_v53, %v1085_v7 }
 0x7fd   :  { %v1138_v14 = vpop.permute.xlu2 %1137 }
 0x804   :  { %v1099_v9 = vpop.permute.xlu1 %1098 }
 0x805   :  { %v1114_v21 = vsel %vm112_vm0, %v1095_v19, %v1099_v9  ;;  %v1089_v25 = vpop.permute.xlu2 %1088 }
 0x806   :  { %v1115_v24 = vsel %vm1110_vm2, %v1114_v21, %v1103_v6  ;;  %v1111_v34 = vsel %vm1110_vm2, %v1109_v32, %v1089_v25 }
 0x80c   :  { %v1134_v5 = vpop.permute.xlu0 %1133  ;;  %v1107_v16 = vpop.permute.xlu1 %1106 }
 0x80d   :  { %v1147_v15 = vsel %vm112_vm0, %v1130_v13, %v1134_v5  ;;  %v1116_v26 = vsel %vm1112_vm3, %v1115_v24, %v1107_v16 }
 0x80e   :  { %v1148_v17 = vsel %vm1110_vm2, %v1147_v15, %v1138_v14 }
 0x814   :  { %v1120_v10 = vpop.permute.xlu0 %1119  ;;  %v1093_v28 = vpop.permute.xlu1 %1092 }
 0x815   :  { %v1144_v27 = vsel %vm112_vm0, %v1081_v58, %v1120_v10  ;;  %v1113_v36 = vsel %vm1112_vm3, %v1111_v34, %v1093_v28 }
 0x81c   :  { %v1142_v11 = vpop.permute.xlu0 %1141 }
 0x81d   :  { %v1149_v20 = vsel %vm1112_vm3, %v1148_v17, %v1142_v11 }
 0x81e   :  { %v1153_v23 = vrot.slane %v1149_v20, 7 }
 0x820   :  { %v1158_v29 = vsel %vm1156_vm4, %v1116_v26, %v1153_v23 }
 0x821   :  { %v1161_v37 = vrot.slane %v1158_v29, 6 }
 0x824   :  { %v1124_v18 = vpop.permute.xlu0 %1123 }
 0x825   :  { %v1145_v30 = vsel %vm1110_vm2, %v1144_v27, %v1124_v18 }
 0x82c   :  { %v1128_v31 = vpop.permute.xlu0 %1127 }
 0x82d   :  { %v1146_v33 = vsel %vm1112_vm3, %v1145_v30, %v1128_v31 }
 0x82e   :  { %v1152_v35 = vrot.slane %v1146_v33, 7 }
 0x830   :  { %v1157_v12 = vsel %vm1156_vm4, %v1113_v36, %v1152_v35 }
 0x831   :  { %v1163_v39 = vsel %vm1162_vm5, %v1157_v12, %v1161_v37 }
 0x832   :  { %1165 = vst [vmem:[#allocation10] sm:$0xf] %v1163_v39 }
 0x833   :  { %1176 = dma.vmem_to_hbm [thread:$0]  %s1172_s15, 64, %s1174_s7, [#allocation4]  }
 0x834   :  { %1528 = dma.done.wait [#allocation4], 64  }
 0x835   :  { %1529 = vsyncadd [#allocation4], 4294967232 }
 0x836   :  { %1181 = vsyncpa [#allocation3], 1 }
 0x837   :  { %1182 = vsyncpa [#allocation6], 1 }
 0x838   :  { %1183 = vsyncpa [#allocation9], 1 }
 0x839   :  { %1184 = vsyncpa [#allocation4], 1 }

</bundles_post_ra>
